<compile_context>
chip_gen: v6e
topology: v6e:2x2x1
jax: 0.10.0
libtpu: 0.0.40
codegen_flags: <defaults>
</compile_context>

<pallas_src>
import functools
import math

import jax
import jax.numpy as jnp
from jax.experimental import pallas as pl
from jax.experimental.pallas import tpu as pltpu


_VMEM = pl.BlockSpec(memory_space=pltpu.MemorySpace.VMEM)
_PARALLEL_B = pltpu.CompilerParams(dimension_semantics=("parallel",))


def _wspec(a):
    """Full-array weight block, resident across all grid steps (same block every step)."""
    return pl.BlockSpec(a.shape, lambda b: (0, 0))


def _layernorm(x, gamma, beta, eps=1e-5):
    mean = jnp.mean(x, axis=-1, keepdims=True)
    var = jnp.mean(jnp.square(x - mean), axis=-1, keepdims=True)
    return (x - mean) * jax.lax.rsqrt(var + eps) * gamma + beta


# ------------------------------------------------------------------- fused dual-Mamba kernel

def _mamba_dual_kernel(x_ref, ln_g_ref, ln_b_ref, W_in_ref, b_in_ref,
                       conv_w_ref, conv_b_ref, W_xd_ref, b_xd_ref,
                       W_xB_T_ref, b_xB_ref, W_dt_ref, b_dt_ref,
                       A_T_ref, Bsel_ref, D_ref, W_out_ref, b_out_ref,
                       o_ref, y_scr):
    L = x_ref.shape[1]
    x = x_ref[0].astype(jnp.float32)                               # (L, d_model)

    # --- norm1 ---
    xn = _layernorm(x, ln_g_ref[...], ln_b_ref[...])

    # --- in_proj for BOTH mamba blocks at once (channel-concatenated -> 128 lanes) ---
    h = jnp.dot(xn, W_in_ref[...], preferred_element_type=jnp.float32) + b_in_ref[...]
    C = h.shape[1]                                                 # 2*d_inner

    # --- depthwise conv1d (k=3, pad=1): halo handled in-kernel (no HBM pad copy), + SiLU ---
    row = jax.lax.broadcasted_iota(jnp.int32, (L, C), 0)
    h_prev = jnp.where(row == 0, 0.0, pltpu.roll(h, shift=1, axis=0))        # x[t-1]
    h_next = jnp.where(row == L - 1, 0.0, pltpu.roll(h, shift=L - 1, axis=0))  # x[t+1]
    cw = conv_w_ref[...]
    h = h_prev * cw[0:1, :] + h * cw[1:2, :] + h_next * cw[2:3, :] + conv_b_ref[...]
    h = h * (1.0 / (1.0 + jnp.exp(-h)))                            # SiLU
    # dropout: identity (eval)

    # --- x_proj (block-diagonal, split into delta part + transposed B part), dt_proj, softplus
    delta_raw = jnp.dot(h, W_xd_ref[...], preferred_element_type=jnp.float32) + b_xd_ref[...]
    delta = jnp.dot(delta_raw, W_dt_ref[...], preferred_element_type=jnp.float32) + b_dt_ref[...]
    delta = jnp.maximum(delta, 0.0) + jnp.log1p(jnp.exp(-jnp.abs(delta)))    # stable softplus
    # B produced directly in (2*n_ssm, L) layout: B_T[n, t] = sum_c h[t, c] * WxB[c, n]
    B_T = jax.lax.dot_general(W_xB_T_ref[...], h, (((1,), (1,)), ((), ())),
                              preferred_element_type=jnp.float32) + b_xB_ref[...]

    # --- selective scan: exp()/outer-products hoisted out of the recurrence ---
    # state layout (2*n_ssm, 2*d_inner): the fused channel dim (128) sits on lanes.
    A_T = A_T_ref[...]
    Bsel = Bsel_ref[...]
    du = delta * h
    dA = [jnp.exp(delta[t:t + 1, :] * A_T) for t in range(L)]       # vectorized, off crit-path
    dBu = [du[t:t + 1, :] * B_T[:, t:t + 1] * Bsel for t in range(L)]
    state = jnp.zeros(A_T.shape, jnp.float32)
    for t in range(L):                                              # unrolled FMA recurrence
        state = dA[t] * state + dBu[t]
        y_scr[t:t + 1, :] = jnp.sum(state, axis=0, keepdims=True)
    # TODO(synk): for long sequences, chunk the scan over an "arbitrary" L grid axis with the
    # state carried in persistent VMEM scratch instead of fully unrolling in one kernel call.
    y = y_scr[...] + h * D_ref[...]
    # dropout: identity (eval)

    # --- out_proj: stacked W_out sums the two blocks' outputs; *0.5 = average of the 2 blocks
    m = (jnp.dot(y, W_out_ref[...], preferred_element_type=jnp.float32) + b_out_ref[...]) * 0.5
    o_ref[0] = m.astype(o_ref.dtype)


# ------------------------------------------------------------------- fused attention kernel

def _attention_kernel(x_ref, ln_g_ref, ln_b_ref, Wqkv_ref, bqkv_ref,
                      Wout_ref, bout_ref, o_ref, *, n_heads):
    x = x_ref[0].astype(jnp.float32)                               # (L, d_model) mamba-path out
    d_model = x.shape[1]
    dk = d_model // n_heads
    scale = 1.0 / math.sqrt(dk)

    xn = _layernorm(x, ln_g_ref[...], ln_b_ref[...])               # norm2
    qkv = jnp.dot(xn, Wqkv_ref[...], preferred_element_type=jnp.float32) + bqkv_ref[...]
    q = qkv[:, 0:d_model]
    k = qkv[:, d_model:2 * d_model]
    v = qkv[:, 2 * d_model:3 * d_model]

    acc = jnp.zeros((x.shape[0], d_model), jnp.float32)
    for h in range(n_heads):                                       # static, fully unrolled
        sl = slice(h * dk, (h + 1) * dk)
        s = jax.lax.dot_general(q[:, sl], k[:, sl], (((1,), (1,)), ((), ())),
                                preferred_element_type=jnp.float32) * scale
        s = s - jnp.max(s, axis=-1, keepdims=True)
        p = jnp.exp(s)
        p = p / jnp.sum(p, axis=-1, keepdims=True)
        # attention dropout: identity (eval)
        o_h = jnp.dot(p, v[:, sl], preferred_element_type=jnp.float32)      # (L, dk)
        # fold out_proj into the head loop: attn @ Wout == sum_h o_h @ Wout[h*dk:(h+1)*dk]
        acc = acc + jnp.dot(o_h, Wout_ref[sl, :], preferred_element_type=jnp.float32)
    out = acc + bout_ref[...]
    o_ref[0] = (out + x).astype(o_ref.dtype)                       # residual add (+dropout=id)


# ------------------------------------------------------------- final LayerNorm + pool + proj

def _final_pool_kernel(x_ref, ln_g_ref, ln_b_ref, W_ref, b_ref, o_ref):
    Bn = x_ref.shape[0]
    for b in range(Bn):                                            # B is tiny & static
        xb = _layernorm(x_ref[b].astype(jnp.float32), ln_g_ref[...], ln_b_ref[...])
        pooled = jnp.mean(xb, axis=0, keepdims=True)               # mean over sequence, (1, d)
        o_ref[b:b + 1, :] = (jnp.dot(pooled, W_ref[...], preferred_element_type=jnp.float32)
                             + b_ref[...]).astype(o_ref.dtype)


# ---------------------------------------------------------------------------------- wrappers

def mamba_dual(x, p):
    B, L, d_model = x.shape
    d2 = p["W_in"].shape[1]                                        # 2*d_inner (=128)
    weights = (p["ln_g"], p["ln_b"], p["W_in"], p["b_in"], p["conv_w"], p["conv_b"],
               p["W_xd"], p["b_xd"], p["W_xB_T"], p["b_xB"], p["W_dt"], p["b_dt"],
               p["A_T"], p["Bsel"], p["D"], p["W_out"], p["b_out"])
    x_spec = pl.BlockSpec((1, L, d_model), lambda b: (b, 0, 0))
    return pl.pallas_call(
        _mamba_dual_kernel,
        out_shape=jax.ShapeDtypeStruct((B, L, d_model), jnp.float32),
        grid=(B,),
        in_specs=[x_spec] + [_wspec(w) for w in weights],
        out_specs=x_spec,
        scratch_shapes=[pltpu.VMEM((L, d2), jnp.float32)],
        compiler_params=_PARALLEL_B,
    )(x, *weights)


def attention(x, p, n_heads):
    B, L, d_model = x.shape
    weights = (p["ln_g"], p["ln_b"], p["Wqkv"], p["bqkv"], p["Wout"], p["bout"])
    x_spec = pl.BlockSpec((1, L, d_model), lambda b: (b, 0, 0))
    return pl.pallas_call(
        functools.partial(_attention_kernel, n_heads=n_heads),
        out_shape=jax.ShapeDtypeStruct((B, L, d_model), jnp.float32),
        grid=(B,),
        in_specs=[x_spec] + [_wspec(w) for w in weights],
        out_specs=x_spec,
        compiler_params=_PARALLEL_B,
    )(x, *weights)


def final_pool(x, g, b, W, bias):
    Bn = x.shape[0]
    return pl.pallas_call(
        _final_pool_kernel,
        out_shape=jax.ShapeDtypeStruct((Bn, W.shape[1]), jnp.float32),
        in_specs=[_VMEM] * 5,
        out_specs=_VMEM,
    )(x, g, b, W, bias)


def sequence_to_vector(input_ids, params, *, n_heads):
    # TODO(synk): embedding token gather left to XLA (jnp.take); no clean Pallas equivalent
    # worth a kernel at this size.
    x = jnp.take(params["embedding"], input_ids, axis=0)           # (B, L, d_model)
    for layer in params["layers"]:
        m = mamba_dual(x, layer["mamba"])          # (mamba0(norm1(x)) + mamba1(norm1(x))) / 2
        x = attention(m, layer["attn"], n_heads)   # attention(norm2(m)) + m
    return final_pool(x, params["norm_f_g"], params["norm_f_b"],
                      params["W_proj"], params["b_proj"])


# -------------------------------------------------------------------------------- param init

def _linear(key, fan_in, fan_out, w_scale=0.08, b_scale=0.02):
    k1, k2 = jax.random.split(key)
    return (jax.random.normal(k1, (fan_in, fan_out), jnp.float32) * w_scale,
            jax.random.normal(k2, (fan_out,), jnp.float32) * b_scale)


def _init_mamba(key, d_model, d_inner, n_ssm, dt_rank):
    ks = jax.random.split(key, 8)
    W_in, b_in = _linear(ks[0], d_model, d_inner)
    conv_w = jax.random.normal(ks[1], (3, d_inner), jnp.float32) * 0.2   # taps-first depthwise
    conv_b = jax.random.normal(ks[2], (d_inner,), jnp.float32) * 0.02
    W_x, b_x = _linear(ks[3], d_inner, dt_rank + n_ssm)
    W_dt, b_dt = _linear(ks[4], dt_rank, d_inner)
    W_out, b_out = _linear(ks[5], d_inner, d_model)
    A_log = jax.random.normal(ks[6], (d_inner, n_ssm), jnp.float32)
    D = jax.random.normal(ks[7], (d_inner,), jnp.float32)
    return dict(W_in=W_in, b_in=b_in, conv_w=conv_w, conv_b=conv_b, W_x=W_x, b_x=b_x,
                W_dt=W_dt, b_dt=b_dt, W_out=W_out, b_out=b_out, A_log=A_log, D=D)


def _fuse_dual_mamba(m0, m1, ln_g, ln_b, d_inner, n_ssm, dt_rank):
    """Fuse two independent MambaBlocks along the channel axis (d_inner -> 2*d_inner = 128).
    x_proj / dt_proj / A are laid out block-diagonally so cross-block terms are exactly zero."""
    d2, dt2, n2 = 2 * d_inner, 2 * dt_rank, 2 * n_ssm
    W_xd = jnp.zeros((d2, dt2), jnp.float32)
    W_xd = W_xd.at[:d_inner, :dt_rank].set(m0["W_x"][:, :dt_rank])
    W_xd = W_xd.at[d_inner:, dt_rank:].set(m1["W_x"][:, :dt_rank])
    b_xd = jnp.concatenate([m0["b_x"][:dt_rank], m1["b_x"][:dt_rank]])[None, :]
    W_xB_T = jnp.zeros((n2, d2), jnp.float32)
    W_xB_T = W_xB_T.at[:n_ssm, :d_inner].set(m0["W_x"][:, dt_rank:].T)
    W_xB_T = W_xB_T.at[n_ssm:, d_inner:].set(m1["W_x"][:, dt_rank:].T)
    b_xB = jnp.concatenate([m0["b_x"][dt_rank:], m1["b_x"][dt_rank:]])[:, None]
    W_dt = jnp.zeros((dt2, d2), jnp.float32)
    W_dt = W_dt.at[:dt_rank, :d_inner].set(m0["W_dt"])
    W_dt = W_dt.at[dt_rank:, d_inner:].set(m1["W_dt"])
    A_T = jnp.zeros((n2, d2), jnp.float32)
    A_T = A_T.at[:n_ssm, :d_inner].set((-jnp.exp(m0["A_log"].astype(jnp.float32))).T)
    A_T = A_T.at[n_ssm:, d_inner:].set((-jnp.exp(m1["A_log"].astype(jnp.float32))).T)
    Bsel = jnp.zeros((n2, d2), jnp.float32)
    Bsel = Bsel.at[:n_ssm, :d_inner].set(1.0)
    Bsel = Bsel.at[n_ssm:, d_inner:].set(1.0)
    return dict(
        ln_g=ln_g[None, :], ln_b=ln_b[None, :],
        W_in=jnp.concatenate([m0["W_in"], m1["W_in"]], axis=1),
        b_in=jnp.concatenate([m0["b_in"], m1["b_in"]])[None, :],
        conv_w=jnp.concatenate([m0["conv_w"], m1["conv_w"]], axis=1),
        conv_b=jnp.concatenate([m0["conv_b"], m1["conv_b"]])[None, :],
        W_xd=W_xd, b_xd=b_xd, W_xB_T=W_xB_T, b_xB=b_xB,
        W_dt=W_dt, b_dt=jnp.concatenate([m0["b_dt"], m1["b_dt"]])[None, :],
        A_T=A_T, Bsel=Bsel,
        D=jnp.concatenate([m0["D"], m1["D"]])[None, :],
        W_out=jnp.concatenate([m0["W_out"], m1["W_out"]], axis=0),
        b_out=(m0["b_out"] + m1["b_out"])[None, :],
    )


def _init_layer(key, d_model, d_inner, n_ssm, dt_rank, n_heads):
    ks = jax.random.split(key, 4)
    m0 = _init_mamba(ks[0], d_model, d_inner, n_ssm, dt_rank)
    m1 = _init_mamba(ks[1], d_model, d_inner, n_ssm, dt_rank)
    mamba = _fuse_dual_mamba(m0, m1, jnp.ones((d_model,), jnp.float32),
                             jnp.zeros((d_model,), jnp.float32), d_inner, n_ssm, dt_rank)
    dk = d_model // n_heads
    Wqkv, bqkv = _linear(ks[2], d_model, 3 * d_model)
    Wout, bout = _linear(ks[3], d_model, d_model)
    # Permute the head-major [q|k|v]-interleaved qkv columns into grouped [Q | K | V] layout so
    # the kernel gets lane-contiguous q/k/v slabs (same math as torch's view+transpose+chunk).
    perm = jnp.array([h * 3 * dk + s * dk + j
                      for s in range(3) for h in range(n_heads) for j in range(dk)],
                     dtype=jnp.int32)
    attn = dict(ln_g=jnp.ones((1, d_model), jnp.float32),
                ln_b=jnp.zeros((1, d_model), jnp.float32),
                Wqkv=Wqkv[:, perm], bqkv=bqkv[perm][None, :],
                Wout=Wout, bout=bout[None, :])
    return dict(mamba=mamba, attn=attn)


def init_model(key, vocab_size, d_model, d_inner, n_ssm, dt_rank, n_heads, n_layer, output_dim):
    ks = jax.random.split(key, n_layer + 2)
    embedding = jax.random.normal(ks[0], (vocab_size, d_model), jnp.float32) * 0.1
    layers = [_init_layer(ks[i + 1], d_model, d_inner, n_ssm, dt_rank, n_heads)
              for i in range(n_layer)]
    W_proj, b_proj = _linear(ks[-1], d_model, output_dim)
    return dict(embedding=embedding, layers=layers,
                norm_f_g=jnp.ones((1, d_model), jnp.float32),
                norm_f_b=jnp.zeros((1, d_model), jnp.float32),
                W_proj=W_proj, b_proj=b_proj[None, :])


if __name__ == "__main__":
    d_model, d_inner, n_ssm, dt_rank = 32, 64, 16, 8
    n_heads, n_layer, vocab_size, output_dim = 4, 2, 32, 64
    batch, seq = 2, 8

    root = jax.random.PRNGKey(0)
    k_ids, k_params = jax.random.split(root)
    input_ids = jax.random.randint(k_ids, (batch, seq), 0, vocab_size, dtype=jnp.int32)
    params = init_model(k_params, vocab_size, d_model, d_inner, n_ssm, dt_rank,
                        n_heads, n_layer, output_dim)

    fwd = jax.jit(functools.partial(sequence_to_vector, n_heads=n_heads))
    out = fwd(input_ids, params)
    jax.block_until_ready(out)

    assert out.shape == (batch, output_dim)
    assert bool(jnp.all(jnp.isfinite(out)))
    print("KERNEL_OK")
</pallas_src>

<mosaic_0001>
module attributes {stable_mosaic.version = 11 : i64} {
  func.func @_attention_kernel(%arg0: i32, %arg1: memref<1x8x32xf32, #tpu.memory_space<vmem>>, %arg2: memref<1x32xf32, #tpu.memory_space<vmem>>, %arg3: memref<1x32xf32, #tpu.memory_space<vmem>>, %arg4: memref<32x96xf32, #tpu.memory_space<vmem>>, %arg5: memref<1x96xf32, #tpu.memory_space<vmem>>, %arg6: memref<32x32xf32, #tpu.memory_space<vmem>>, %arg7: memref<1x32xf32, #tpu.memory_space<vmem>>, %arg8: memref<1x8x32xf32, #tpu.memory_space<vmem>>) attributes {dimension_semantics = [#tpu.dimension_semantics<parallel>], iteration_bounds = array<i64: 2>, scalar_prefetch = 0 : i64, scratch_operands = 0 : i64, tpu.core_type = #tpu.core_type<tc>, window_params = [{transform_indices = @transform_0, window_bounds = array<i64: 1, 8, 32>}, {pipeline_mode = #tpu.pipeline_mode<synchronous>, transform_indices = @transform_1, window_bounds = array<i64: 1, 32>}, {pipeline_mode = #tpu.pipeline_mode<synchronous>, transform_indices = @transform_2, window_bounds = array<i64: 1, 32>}, {pipeline_mode = #tpu.pipeline_mode<synchronous>, transform_indices = @transform_3, window_bounds = array<i64: 32, 96>}, {pipeline_mode = #tpu.pipeline_mode<synchronous>, transform_indices = @transform_4, window_bounds = array<i64: 1, 96>}, {pipeline_mode = #tpu.pipeline_mode<synchronous>, transform_indices = @transform_5, window_bounds = array<i64: 32, 32>}, {pipeline_mode = #tpu.pipeline_mode<synchronous>, transform_indices = @transform_6, window_bounds = array<i64: 1, 32>}, {transform_indices = @transform_7, window_bounds = array<i64: 1, 8, 32>}]} {
    %c0 = arith.constant 0 : index
    %c0_0 = arith.constant 0 : index
    %c0_1 = arith.constant 0 : index
    %0 = vector.load %arg1[%c0, %c0_0, %c0_1] : memref<1x8x32xf32, #tpu.memory_space<vmem>>, vector<1x8x32xf32>
    %1 = vector.shape_cast %0 : vector<1x8x32xf32> to vector<8x32xf32>
    %c0_2 = arith.constant 0 : index
    %c0_3 = arith.constant 0 : index
    %2 = vector.load %arg2[%c0_2, %c0_3] : memref<1x32xf32, #tpu.memory_space<vmem>>, vector<1x32xf32>
    %c0_4 = arith.constant 0 : index
    %c0_5 = arith.constant 0 : index
    %3 = vector.load %arg3[%c0_4, %c0_5] : memref<1x32xf32, #tpu.memory_space<vmem>>, vector<1x32xf32>
    %cst = arith.constant dense<0.000000e+00> : vector<8xf32>
    %4 = vector.multi_reduction <add>, %1, %cst [1] : vector<8x32xf32> to vector<8xf32>
    %5 = vector.shape_cast %4 : vector<8xf32> to vector<8x1xf32>
    %cst_6 = arith.constant 3.200000e+01 : f32
    %6 = vector.broadcast %cst_6 : f32 to vector<8x1xf32>
    %7 = arith.divf %5, %6 : vector<8x1xf32>
    %8 = vector.broadcast %7 : vector<8x1xf32> to vector<8x32xf32>
    %9 = arith.subf %1, %8 : vector<8x32xf32>
    %10 = arith.mulf %9, %9 : vector<8x32xf32>
    %cst_7 = arith.constant dense<0.000000e+00> : vector<8xf32>
    %11 = vector.multi_reduction <add>, %10, %cst_7 [1] : vector<8x32xf32> to vector<8xf32>
    %12 = vector.shape_cast %11 : vector<8xf32> to vector<8x1xf32>
    %cst_8 = arith.constant 3.200000e+01 : f32
    %13 = vector.broadcast %cst_8 : f32 to vector<8x1xf32>
    %14 = arith.divf %12, %13 : vector<8x1xf32>
    %15 = vector.broadcast %7 : vector<8x1xf32> to vector<8x32xf32>
    %16 = arith.subf %1, %15 : vector<8x32xf32>
    %cst_9 = arith.constant 9.99999974E-6 : f32
    %17 = vector.broadcast %cst_9 : f32 to vector<8x1xf32>
    %18 = arith.addf %14, %17 : vector<8x1xf32>
    %19 = math.rsqrt %18 : vector<8x1xf32>
    %20 = vector.broadcast %19 : vector<8x1xf32> to vector<8x32xf32>
    %21 = arith.mulf %16, %20 : vector<8x32xf32>
    %22 = vector.broadcast %2 : vector<1x32xf32> to vector<8x32xf32>
    %23 = arith.mulf %21, %22 : vector<8x32xf32>
    %24 = vector.broadcast %3 : vector<1x32xf32> to vector<8x32xf32>
    %25 = arith.addf %23, %24 : vector<8x32xf32>
    %c0_10 = arith.constant 0 : index
    %c0_11 = arith.constant 0 : index
    %26 = vector.load %arg4[%c0_10, %c0_11] : memref<32x96xf32, #tpu.memory_space<vmem>>, vector<32x96xf32>
    %cst_12 = arith.constant dense<0.000000e+00> : vector<8x96xf32>
    %27 = tpu.matmul %25, %26, %cst_12 {dimension_numbers = #tpu.dot_dimension_numbers<[1], [0], [0], [1], [0, 0, 1, 1], [], []>} : vector<8x32xf32>, vector<32x96xf32>, vector<8x96xf32> -> vector<8x96xf32>
    %c0_13 = arith.constant 0 : index
    %c0_14 = arith.constant 0 : index
    %28 = vector.load %arg5[%c0_13, %c0_14] : memref<1x96xf32, #tpu.memory_space<vmem>>, vector<1x96xf32>
    %29 = vector.broadcast %28 : vector<1x96xf32> to vector<8x96xf32>
    %30 = arith.addf %27, %29 : vector<8x96xf32>
    %31 = vector.extract_strided_slice %30 {offsets = [0, 0], sizes = [8, 32], strides = [1, 1]} : vector<8x96xf32> to vector<8x32xf32>
    %32 = vector.extract_strided_slice %30 {offsets = [0, 32], sizes = [8, 32], strides = [1, 1]} : vector<8x96xf32> to vector<8x32xf32>
    %33 = vector.extract_strided_slice %30 {offsets = [0, 64], sizes = [8, 32], strides = [1, 1]} : vector<8x96xf32> to vector<8x32xf32>
    %cst_15 = arith.constant 0.000000e+00 : f32
    %34 = vector.broadcast %cst_15 : f32 to vector<8x32xf32>
    %35 = vector.extract_strided_slice %31 {offsets = [0, 0], sizes = [8, 8], strides = [1, 1]} : vector<8x32xf32> to vector<8x8xf32>
    %36 = vector.extract_strided_slice %32 {offsets = [0, 0], sizes = [8, 8], strides = [1, 1]} : vector<8x32xf32> to vector<8x8xf32>
    %cst_16 = arith.constant dense<0.000000e+00> : vector<8x8xf32>
    %37 = tpu.matmul %35, %36, %cst_16 {dimension_numbers = #tpu.dot_dimension_numbers<[1], [1], [0], [0], [0, 0, 1, 0], [], []>} : vector<8x8xf32>, vector<8x8xf32>, vector<8x8xf32> -> vector<8x8xf32>
    %cst_17 = arith.constant 0.353553385 : f32
    %38 = vector.broadcast %cst_17 : f32 to vector<8x8xf32>
    %39 = arith.mulf %37, %38 : vector<8x8xf32>
    %cst_18 = arith.constant dense<0xFF800000> : vector<8xf32>
    %40 = vector.multi_reduction <maximumf>, %39, %cst_18 [1] : vector<8x8xf32> to vector<8xf32>
    %41 = vector.shape_cast %40 : vector<8xf32> to vector<8x1xf32>
    %42 = vector.broadcast %41 : vector<8x1xf32> to vector<8x8xf32>
    %43 = arith.subf %39, %42 : vector<8x8xf32>
    %44 = math.exp %43 : vector<8x8xf32>
    %cst_19 = arith.constant dense<0.000000e+00> : vector<8xf32>
    %45 = vector.multi_reduction <add>, %44, %cst_19 [1] : vector<8x8xf32> to vector<8xf32>
    %46 = vector.shape_cast %45 : vector<8xf32> to vector<8x1xf32>
    %47 = vector.broadcast %46 : vector<8x1xf32> to vector<8x8xf32>
    %48 = arith.divf %44, %47 : vector<8x8xf32>
    %49 = vector.extract_strided_slice %33 {offsets = [0, 0], sizes = [8, 8], strides = [1, 1]} : vector<8x32xf32> to vector<8x8xf32>
    %cst_20 = arith.constant dense<0.000000e+00> : vector<8x8xf32>
    %50 = tpu.matmul %48, %49, %cst_20 {dimension_numbers = #tpu.dot_dimension_numbers<[1], [0], [0], [1], [0, 0, 1, 1], [], []>} : vector<8x8xf32>, vector<8x8xf32>, vector<8x8xf32> -> vector<8x8xf32>
    %c0_21 = arith.constant 0 : index
    %c0_22 = arith.constant 0 : index
    %51 = vector.load %arg6[%c0_21, %c0_22] : memref<32x32xf32, #tpu.memory_space<vmem>>, vector<8x32xf32>
    %cst_23 = arith.constant dense<0.000000e+00> : vector<8x32xf32>
    %52 = tpu.matmul %50, %51, %cst_23 {dimension_numbers = #tpu.dot_dimension_numbers<[1], [0], [0], [1], [0, 0, 1, 1], [], []>} : vector<8x8xf32>, vector<8x32xf32>, vector<8x32xf32> -> vector<8x32xf32>
    %53 = arith.addf %34, %52 : vector<8x32xf32>
    %54 = vector.extract_strided_slice %31 {offsets = [0, 8], sizes = [8, 8], strides = [1, 1]} : vector<8x32xf32> to vector<8x8xf32>
    %55 = vector.extract_strided_slice %32 {offsets = [0, 8], sizes = [8, 8], strides = [1, 1]} : vector<8x32xf32> to vector<8x8xf32>
    %cst_24 = arith.constant dense<0.000000e+00> : vector<8x8xf32>
    %56 = tpu.matmul %54, %55, %cst_24 {dimension_numbers = #tpu.dot_dimension_numbers<[1], [1], [0], [0], [0, 0, 1, 0], [], []>} : vector<8x8xf32>, vector<8x8xf32>, vector<8x8xf32> -> vector<8x8xf32>
    %cst_25 = arith.constant 0.353553385 : f32
    %57 = vector.broadcast %cst_25 : f32 to vector<8x8xf32>
    %58 = arith.mulf %56, %57 : vector<8x8xf32>
    %cst_26 = arith.constant dense<0xFF800000> : vector<8xf32>
    %59 = vector.multi_reduction <maximumf>, %58, %cst_26 [1] : vector<8x8xf32> to vector<8xf32>
    %60 = vector.shape_cast %59 : vector<8xf32> to vector<8x1xf32>
    %61 = vector.broadcast %60 : vector<8x1xf32> to vector<8x8xf32>
    %62 = arith.subf %58, %61 : vector<8x8xf32>
    %63 = math.exp %62 : vector<8x8xf32>
    %cst_27 = arith.constant dense<0.000000e+00> : vector<8xf32>
    %64 = vector.multi_reduction <add>, %63, %cst_27 [1] : vector<8x8xf32> to vector<8xf32>
    %65 = vector.shape_cast %64 : vector<8xf32> to vector<8x1xf32>
    %66 = vector.broadcast %65 : vector<8x1xf32> to vector<8x8xf32>
    %67 = arith.divf %63, %66 : vector<8x8xf32>
    %68 = vector.extract_strided_slice %33 {offsets = [0, 8], sizes = [8, 8], strides = [1, 1]} : vector<8x32xf32> to vector<8x8xf32>
    %cst_28 = arith.constant dense<0.000000e+00> : vector<8x8xf32>
    %69 = tpu.matmul %67, %68, %cst_28 {dimension_numbers = #tpu.dot_dimension_numbers<[1], [0], [0], [1], [0, 0, 1, 1], [], []>} : vector<8x8xf32>, vector<8x8xf32>, vector<8x8xf32> -> vector<8x8xf32>
    %c8 = arith.constant 8 : index
    %c0_29 = arith.constant 0 : index
    %70 = vector.load %arg6[%c8, %c0_29] : memref<32x32xf32, #tpu.memory_space<vmem>>, vector<8x32xf32>
    %cst_30 = arith.constant dense<0.000000e+00> : vector<8x32xf32>
    %71 = tpu.matmul %69, %70, %cst_30 {dimension_numbers = #tpu.dot_dimension_numbers<[1], [0], [0], [1], [0, 0, 1, 1], [], []>} : vector<8x8xf32>, vector<8x32xf32>, vector<8x32xf32> -> vector<8x32xf32>
    %72 = arith.addf %53, %71 : vector<8x32xf32>
    %73 = vector.extract_strided_slice %31 {offsets = [0, 16], sizes = [8, 8], strides = [1, 1]} : vector<8x32xf32> to vector<8x8xf32>
    %74 = vector.extract_strided_slice %32 {offsets = [0, 16], sizes = [8, 8], strides = [1, 1]} : vector<8x32xf32> to vector<8x8xf32>
    %cst_31 = arith.constant dense<0.000000e+00> : vector<8x8xf32>
    %75 = tpu.matmul %73, %74, %cst_31 {dimension_numbers = #tpu.dot_dimension_numbers<[1], [1], [0], [0], [0, 0, 1, 0], [], []>} : vector<8x8xf32>, vector<8x8xf32>, vector<8x8xf32> -> vector<8x8xf32>
    %cst_32 = arith.constant 0.353553385 : f32
    %76 = vector.broadcast %cst_32 : f32 to vector<8x8xf32>
    %77 = arith.mulf %75, %76 : vector<8x8xf32>
    %cst_33 = arith.constant dense<0xFF800000> : vector<8xf32>
    %78 = vector.multi_reduction <maximumf>, %77, %cst_33 [1] : vector<8x8xf32> to vector<8xf32>
    %79 = vector.shape_cast %78 : vector<8xf32> to vector<8x1xf32>
    %80 = vector.broadcast %79 : vector<8x1xf32> to vector<8x8xf32>
    %81 = arith.subf %77, %80 : vector<8x8xf32>
    %82 = math.exp %81 : vector<8x8xf32>
    %cst_34 = arith.constant dense<0.000000e+00> : vector<8xf32>
    %83 = vector.multi_reduction <add>, %82, %cst_34 [1] : vector<8x8xf32> to vector<8xf32>
    %84 = vector.shape_cast %83 : vector<8xf32> to vector<8x1xf32>
    %85 = vector.broadcast %84 : vector<8x1xf32> to vector<8x8xf32>
    %86 = arith.divf %82, %85 : vector<8x8xf32>
    %87 = vector.extract_strided_slice %33 {offsets = [0, 16], sizes = [8, 8], strides = [1, 1]} : vector<8x32xf32> to vector<8x8xf32>
    %cst_35 = arith.constant dense<0.000000e+00> : vector<8x8xf32>
    %88 = tpu.matmul %86, %87, %cst_35 {dimension_numbers = #tpu.dot_dimension_numbers<[1], [0], [0], [1], [0, 0, 1, 1], [], []>} : vector<8x8xf32>, vector<8x8xf32>, vector<8x8xf32> -> vector<8x8xf32>
    %c16 = arith.constant 16 : index
    %c0_36 = arith.constant 0 : index
    %89 = vector.load %arg6[%c16, %c0_36] : memref<32x32xf32, #tpu.memory_space<vmem>>, vector<8x32xf32>
    %cst_37 = arith.constant dense<0.000000e+00> : vector<8x32xf32>
    %90 = tpu.matmul %88, %89, %cst_37 {dimension_numbers = #tpu.dot_dimension_numbers<[1], [0], [0], [1], [0, 0, 1, 1], [], []>} : vector<8x8xf32>, vector<8x32xf32>, vector<8x32xf32> -> vector<8x32xf32>
    %91 = arith.addf %72, %90 : vector<8x32xf32>
    %92 = vector.extract_strided_slice %31 {offsets = [0, 24], sizes = [8, 8], strides = [1, 1]} : vector<8x32xf32> to vector<8x8xf32>
    %93 = vector.extract_strided_slice %32 {offsets = [0, 24], sizes = [8, 8], strides = [1, 1]} : vector<8x32xf32> to vector<8x8xf32>
    %cst_38 = arith.constant dense<0.000000e+00> : vector<8x8xf32>
    %94 = tpu.matmul %92, %93, %cst_38 {dimension_numbers = #tpu.dot_dimension_numbers<[1], [1], [0], [0], [0, 0, 1, 0], [], []>} : vector<8x8xf32>, vector<8x8xf32>, vector<8x8xf32> -> vector<8x8xf32>
    %cst_39 = arith.constant 0.353553385 : f32
    %95 = vector.broadcast %cst_39 : f32 to vector<8x8xf32>
    %96 = arith.mulf %94, %95 : vector<8x8xf32>
    %cst_40 = arith.constant dense<0xFF800000> : vector<8xf32>
    %97 = vector.multi_reduction <maximumf>, %96, %cst_40 [1] : vector<8x8xf32> to vector<8xf32>
    %98 = vector.shape_cast %97 : vector<8xf32> to vector<8x1xf32>
    %99 = vector.broadcast %98 : vector<8x1xf32> to vector<8x8xf32>
    %100 = arith.subf %96, %99 : vector<8x8xf32>
    %101 = math.exp %100 : vector<8x8xf32>
    %cst_41 = arith.constant dense<0.000000e+00> : vector<8xf32>
    %102 = vector.multi_reduction <add>, %101, %cst_41 [1] : vector<8x8xf32> to vector<8xf32>
    %103 = vector.shape_cast %102 : vector<8xf32> to vector<8x1xf32>
    %104 = vector.broadcast %103 : vector<8x1xf32> to vector<8x8xf32>
    %105 = arith.divf %101, %104 : vector<8x8xf32>
    %106 = vector.extract_strided_slice %33 {offsets = [0, 24], sizes = [8, 8], strides = [1, 1]} : vector<8x32xf32> to vector<8x8xf32>
    %cst_42 = arith.constant dense<0.000000e+00> : vector<8x8xf32>
    %107 = tpu.matmul %105, %106, %cst_42 {dimension_numbers = #tpu.dot_dimension_numbers<[1], [0], [0], [1], [0, 0, 1, 1], [], []>} : vector<8x8xf32>, vector<8x8xf32>, vector<8x8xf32> -> vector<8x8xf32>
    %c24 = arith.constant 24 : index
    %c0_43 = arith.constant 0 : index
    %108 = vector.load %arg6[%c24, %c0_43] : memref<32x32xf32, #tpu.memory_space<vmem>>, vector<8x32xf32>
    %cst_44 = arith.constant dense<0.000000e+00> : vector<8x32xf32>
    %109 = tpu.matmul %107, %108, %cst_44 {dimension_numbers = #tpu.dot_dimension_numbers<[1], [0], [0], [1], [0, 0, 1, 1], [], []>} : vector<8x8xf32>, vector<8x32xf32>, vector<8x32xf32> -> vector<8x32xf32>
    %110 = arith.addf %91, %109 : vector<8x32xf32>
    %c0_45 = arith.constant 0 : index
    %c0_46 = arith.constant 0 : index
    %111 = vector.load %arg7[%c0_45, %c0_46] : memref<1x32xf32, #tpu.memory_space<vmem>>, vector<1x32xf32>
    %112 = vector.broadcast %111 : vector<1x32xf32> to vector<8x32xf32>
    %113 = arith.addf %110, %112 : vector<8x32xf32>
    %114 = arith.addf %113, %1 : vector<8x32xf32>
    %c0_47 = arith.constant 0 : index
    %c0_48 = arith.constant 0 : index
    %c0_49 = arith.constant 0 : index
    %115 = vector.load %arg8[%c0_47, %c0_48, %c0_49] : memref<1x8x32xf32, #tpu.memory_space<vmem>>, vector<1x8x32xf32>
    %116 = vector.shape_cast %115 : vector<1x8x32xf32> to vector<8x32xf32>
    %117 = vector.shape_cast %114 : vector<8x32xf32> to vector<1x8x32xf32>
    tpu.vector_store %arg8[%c0_47, %c0_48, %c0_49], %117 {strides = array<i32>} : memref<1x8x32xf32, #tpu.memory_space<vmem>>, vector<1x8x32xf32>,
    return
  }
  func.func @transform_0(%arg0: i32) -> (i32, i32, i32) {
    %c0_i32 = arith.constant 0 : i32
    %c0_i32_0 = arith.constant 0 : i32
    %c0_i32_1 = arith.constant 0 : i32
    return %arg0, %c0_i32, %c0_i32_0 : i32, i32, i32
  }
  func.func @transform_1(%arg0: i32) -> (i32, i32) {
    %c0_i32 = arith.constant 0 : i32
    %c0_i32_0 = arith.constant 0 : i32
    %c0_i32_1 = arith.constant 0 : i32
    return %c0_i32, %c0_i32_0 : i32, i32
  }
  func.func @transform_2(%arg0: i32) -> (i32, i32) {
    %c0_i32 = arith.constant 0 : i32
    %c0_i32_0 = arith.constant 0 : i32
    %c0_i32_1 = arith.constant 0 : i32
    return %c0_i32, %c0_i32_0 : i32, i32
  }
  func.func @transform_3(%arg0: i32) -> (i32, i32) {
    %c0_i32 = arith.constant 0 : i32
    %c0_i32_0 = arith.constant 0 : i32
    %c0_i32_1 = arith.constant 0 : i32
    return %c0_i32, %c0_i32_0 : i32, i32
  }
  func.func @transform_4(%arg0: i32) -> (i32, i32) {
    %c0_i32 = arith.constant 0 : i32
    %c0_i32_0 = arith.constant 0 : i32
    %c0_i32_1 = arith.constant 0 : i32
    return %c0_i32, %c0_i32_0 : i32, i32
  }
  func.func @transform_5(%arg0: i32) -> (i32, i32) {
    %c0_i32 = arith.constant 0 : i32
    %c0_i32_0 = arith.constant 0 : i32
    %c0_i32_1 = arith.constant 0 : i32
    return %c0_i32, %c0_i32_0 : i32, i32
  }
  func.func @transform_6(%arg0: i32) -> (i32, i32) {
    %c0_i32 = arith.constant 0 : i32
    %c0_i32_0 = arith.constant 0 : i32
    %c0_i32_1 = arith.constant 0 : i32
    return %c0_i32, %c0_i32_0 : i32, i32
  }
  func.func @transform_7(%arg0: i32) -> (i32, i32, i32) {
    %c0_i32 = arith.constant 0 : i32
    %c0_i32_0 = arith.constant 0 : i32
    %c0_i32_1 = arith.constant 0 : i32
    return %arg0, %c0_i32, %c0_i32_0 : i32, i32, i32
  }
}

module attributes {stable_mosaic.version = 11 : i64} {
  func.func @_final_pool_kernel(%arg0: memref<2x8x32xf32, #tpu.memory_space<vmem>>, %arg1: memref<1x32xf32, #tpu.memory_space<vmem>>, %arg2: memref<1x32xf32, #tpu.memory_space<vmem>>, %arg3: memref<32x64xf32, #tpu.memory_space<vmem>>, %arg4: memref<1x64xf32, #tpu.memory_space<vmem>>, %arg5: memref<2x64xf32, #tpu.memory_space<vmem>>) attributes {dimension_semantics = [], scalar_prefetch = 0 : i64, scratch_operands = 0 : i64, tpu.core_type = #tpu.core_type<tc>} {
    %c0 = arith.constant 0 : index
    %c0_0 = arith.constant 0 : index
    %c0_1 = arith.constant 0 : index
    %0 = vector.load %arg0[%c0, %c0_0, %c0_1] : memref<2x8x32xf32, #tpu.memory_space<vmem>>, vector<1x8x32xf32>
    %1 = vector.shape_cast %0 : vector<1x8x32xf32> to vector<8x32xf32>
    %c0_2 = arith.constant 0 : index
    %c0_3 = arith.constant 0 : index
    %2 = vector.load %arg1[%c0_2, %c0_3] : memref<1x32xf32, #tpu.memory_space<vmem>>, vector<1x32xf32>
    %c0_4 = arith.constant 0 : index
    %c0_5 = arith.constant 0 : index
    %3 = vector.load %arg2[%c0_4, %c0_5] : memref<1x32xf32, #tpu.memory_space<vmem>>, vector<1x32xf32>
    %cst = arith.constant dense<0.000000e+00> : vector<8xf32>
    %4 = vector.multi_reduction <add>, %1, %cst [1] : vector<8x32xf32> to vector<8xf32>
    %5 = vector.shape_cast %4 : vector<8xf32> to vector<8x1xf32>
    %cst_6 = arith.constant 3.200000e+01 : f32
    %6 = vector.broadcast %cst_6 : f32 to vector<8x1xf32>
    %7 = arith.divf %5, %6 : vector<8x1xf32>
    %8 = vector.broadcast %7 : vector<8x1xf32> to vector<8x32xf32>
    %9 = arith.subf %1, %8 : vector<8x32xf32>
    %10 = arith.mulf %9, %9 : vector<8x32xf32>
    %cst_7 = arith.constant dense<0.000000e+00> : vector<8xf32>
    %11 = vector.multi_reduction <add>, %10, %cst_7 [1] : vector<8x32xf32> to vector<8xf32>
    %12 = vector.shape_cast %11 : vector<8xf32> to vector<8x1xf32>
    %cst_8 = arith.constant 3.200000e+01 : f32
    %13 = vector.broadcast %cst_8 : f32 to vector<8x1xf32>
    %14 = arith.divf %12, %13 : vector<8x1xf32>
    %15 = vector.broadcast %7 : vector<8x1xf32> to vector<8x32xf32>
    %16 = arith.subf %1, %15 : vector<8x32xf32>
    %cst_9 = arith.constant 9.99999974E-6 : f32
    %17 = vector.broadcast %cst_9 : f32 to vector<8x1xf32>
    %18 = arith.addf %14, %17 : vector<8x1xf32>
    %19 = math.rsqrt %18 : vector<8x1xf32>
    %20 = vector.broadcast %19 : vector<8x1xf32> to vector<8x32xf32>
    %21 = arith.mulf %16, %20 : vector<8x32xf32>
    %22 = vector.broadcast %2 : vector<1x32xf32> to vector<8x32xf32>
    %23 = arith.mulf %21, %22 : vector<8x32xf32>
    %24 = vector.broadcast %3 : vector<1x32xf32> to vector<8x32xf32>
    %25 = arith.addf %23, %24 : vector<8x32xf32>
    %cst_10 = arith.constant dense<0.000000e+00> : vector<32xf32>
    %26 = vector.multi_reduction <add>, %25, %cst_10 [0] : vector<8x32xf32> to vector<32xf32>
    %27 = vector.shape_cast %26 : vector<32xf32> to vector<1x32xf32>
    %cst_11 = arith.constant 8.000000e+00 : f32
    %28 = vector.broadcast %cst_11 : f32 to vector<1x32xf32>
    %29 = arith.divf %27, %28 : vector<1x32xf32>
    %c0_12 = arith.constant 0 : index
    %c0_13 = arith.constant 0 : index
    %30 = vector.load %arg3[%c0_12, %c0_13] : memref<32x64xf32, #tpu.memory_space<vmem>>, vector<32x64xf32>
    %cst_14 = arith.constant dense<0.000000e+00> : vector<1x64xf32>
    %31 = tpu.matmul %29, %30, %cst_14 {dimension_numbers = #tpu.dot_dimension_numbers<[1], [0], [0], [1], [0, 0, 1, 1], [], []>} : vector<1x32xf32>, vector<32x64xf32>, vector<1x64xf32> -> vector<1x64xf32>
    %c0_15 = arith.constant 0 : index
    %c0_16 = arith.constant 0 : index
    %32 = vector.load %arg4[%c0_15, %c0_16] : memref<1x64xf32, #tpu.memory_space<vmem>>, vector<1x64xf32>
    %33 = arith.addf %31, %32 : vector<1x64xf32>
    %c0_17 = arith.constant 0 : index
    %c0_18 = arith.constant 0 : index
    %34 = vector.load %arg5[%c0_17, %c0_18] : memref<2x64xf32, #tpu.memory_space<vmem>>, vector<1x64xf32>
    tpu.vector_store %arg5[%c0_17, %c0_18], %33 {strides = array<i32>} : memref<2x64xf32, #tpu.memory_space<vmem>>, vector<1x64xf32>,
    %c1 = arith.constant 1 : index
    %c0_19 = arith.constant 0 : index
    %c0_20 = arith.constant 0 : index
    %35 = vector.load %arg0[%c1, %c0_19, %c0_20] : memref<2x8x32xf32, #tpu.memory_space<vmem>>, vector<1x8x32xf32>
    %36 = vector.shape_cast %35 : vector<1x8x32xf32> to vector<8x32xf32>
    %c0_21 = arith.constant 0 : index
    %c0_22 = arith.constant 0 : index
    %37 = vector.load %arg1[%c0_21, %c0_22] : memref<1x32xf32, #tpu.memory_space<vmem>>, vector<1x32xf32>
    %c0_23 = arith.constant 0 : index
    %c0_24 = arith.constant 0 : index
    %38 = vector.load %arg2[%c0_23, %c0_24] : memref<1x32xf32, #tpu.memory_space<vmem>>, vector<1x32xf32>
    %cst_25 = arith.constant dense<0.000000e+00> : vector<8xf32>
    %39 = vector.multi_reduction <add>, %36, %cst_25 [1] : vector<8x32xf32> to vector<8xf32>
    %40 = vector.shape_cast %39 : vector<8xf32> to vector<8x1xf32>
    %cst_26 = arith.constant 3.200000e+01 : f32
    %41 = vector.broadcast %cst_26 : f32 to vector<8x1xf32>
    %42 = arith.divf %40, %41 : vector<8x1xf32>
    %43 = vector.broadcast %42 : vector<8x1xf32> to vector<8x32xf32>
    %44 = arith.subf %36, %43 : vector<8x32xf32>
    %45 = arith.mulf %44, %44 : vector<8x32xf32>
    %cst_27 = arith.constant dense<0.000000e+00> : vector<8xf32>
    %46 = vector.multi_reduction <add>, %45, %cst_27 [1] : vector<8x32xf32> to vector<8xf32>
    %47 = vector.shape_cast %46 : vector<8xf32> to vector<8x1xf32>
    %cst_28 = arith.constant 3.200000e+01 : f32
    %48 = vector.broadcast %cst_28 : f32 to vector<8x1xf32>
    %49 = arith.divf %47, %48 : vector<8x1xf32>
    %50 = vector.broadcast %42 : vector<8x1xf32> to vector<8x32xf32>
    %51 = arith.subf %36, %50 : vector<8x32xf32>
    %cst_29 = arith.constant 9.99999974E-6 : f32
    %52 = vector.broadcast %cst_29 : f32 to vector<8x1xf32>
    %53 = arith.addf %49, %52 : vector<8x1xf32>
    %54 = math.rsqrt %53 : vector<8x1xf32>
    %55 = vector.broadcast %54 : vector<8x1xf32> to vector<8x32xf32>
    %56 = arith.mulf %51, %55 : vector<8x32xf32>
    %57 = vector.broadcast %37 : vector<1x32xf32> to vector<8x32xf32>
    %58 = arith.mulf %56, %57 : vector<8x32xf32>
    %59 = vector.broadcast %38 : vector<1x32xf32> to vector<8x32xf32>
    %60 = arith.addf %58, %59 : vector<8x32xf32>
    %cst_30 = arith.constant dense<0.000000e+00> : vector<32xf32>
    %61 = vector.multi_reduction <add>, %60, %cst_30 [0] : vector<8x32xf32> to vector<32xf32>
    %62 = vector.shape_cast %61 : vector<32xf32> to vector<1x32xf32>
    %cst_31 = arith.constant 8.000000e+00 : f32
    %63 = vector.broadcast %cst_31 : f32 to vector<1x32xf32>
    %64 = arith.divf %62, %63 : vector<1x32xf32>
    %c0_32 = arith.constant 0 : index
    %c0_33 = arith.constant 0 : index
    %65 = vector.load %arg3[%c0_32, %c0_33] : memref<32x64xf32, #tpu.memory_space<vmem>>, vector<32x64xf32>
    %cst_34 = arith.constant dense<0.000000e+00> : vector<1x64xf32>
    %66 = tpu.matmul %64, %65, %cst_34 {dimension_numbers = #tpu.dot_dimension_numbers<[1], [0], [0], [1], [0, 0, 1, 1], [], []>} : vector<1x32xf32>, vector<32x64xf32>, vector<1x64xf32> -> vector<1x64xf32>
    %c0_35 = arith.constant 0 : index
    %c0_36 = arith.constant 0 : index
    %67 = vector.load %arg4[%c0_35, %c0_36] : memref<1x64xf32, #tpu.memory_space<vmem>>, vector<1x64xf32>
    %68 = arith.addf %66, %67 : vector<1x64xf32>
    %c1_37 = arith.constant 1 : index
    %c0_38 = arith.constant 0 : index
    %69 = vector.load %arg5[%c1_37, %c0_38] : memref<2x64xf32, #tpu.memory_space<vmem>>, vector<1x64xf32>
    tpu.vector_store %arg5[%c1_37, %c0_38], %68 {strides = array<i32>} : memref<2x64xf32, #tpu.memory_space<vmem>>, vector<1x64xf32>,
    return
  }
}

module attributes {stable_mosaic.version = 11 : i64} {
  func.func @_mamba_dual_kernel(%arg0: i32, %arg1: memref<1x8x32xf32, #tpu.memory_space<vmem>>, %arg2: memref<1x32xf32, #tpu.memory_space<vmem>>, %arg3: memref<1x32xf32, #tpu.memory_space<vmem>>, %arg4: memref<32x128xf32, #tpu.memory_space<vmem>>, %arg5: memref<1x128xf32, #tpu.memory_space<vmem>>, %arg6: memref<3x128xf32, #tpu.memory_space<vmem>>, %arg7: memref<1x128xf32, #tpu.memory_space<vmem>>, %arg8: memref<128x16xf32, #tpu.memory_space<vmem>>, %arg9: memref<1x16xf32, #tpu.memory_space<vmem>>, %arg10: memref<32x128xf32, #tpu.memory_space<vmem>>, %arg11: memref<32x1xf32, #tpu.memory_space<vmem>>, %arg12: memref<16x128xf32, #tpu.memory_space<vmem>>, %arg13: memref<1x128xf32, #tpu.memory_space<vmem>>, %arg14: memref<32x128xf32, #tpu.memory_space<vmem>>, %arg15: memref<32x128xf32, #tpu.memory_space<vmem>>, %arg16: memref<1x128xf32, #tpu.memory_space<vmem>>, %arg17: memref<128x32xf32, #tpu.memory_space<vmem>>, %arg18: memref<1x32xf32, #tpu.memory_space<vmem>>, %arg19: memref<1x8x32xf32, #tpu.memory_space<vmem>>, %arg20: memref<8x128xf32, #tpu.memory_space<vmem>>) attributes {dimension_semantics = [#tpu.dimension_semantics<parallel>], iteration_bounds = array<i64: 2>, scalar_prefetch = 0 : i64, scratch_operands = 1 : i64, tpu.core_type = #tpu.core_type<tc>, window_params = [{transform_indices = @transform_0, window_bounds = array<i64: 1, 8, 32>}, {pipeline_mode = #tpu.pipeline_mode<synchronous>, transform_indices = @transform_1, window_bounds = array<i64: 1, 32>}, {pipeline_mode = #tpu.pipeline_mode<synchronous>, transform_indices = @transform_2, window_bounds = array<i64: 1, 32>}, {pipeline_mode = #tpu.pipeline_mode<synchronous>, transform_indices = @transform_3, window_bounds = array<i64: 32, 128>}, {pipeline_mode = #tpu.pipeline_mode<synchronous>, transform_indices = @transform_4, window_bounds = array<i64: 1, 128>}, {pipeline_mode = #tpu.pipeline_mode<synchronous>, transform_indices = @transform_5, window_bounds = array<i64: 3, 128>}, {pipeline_mode = #tpu.pipeline_mode<synchronous>, transform_indices = @transform_6, window_bounds = array<i64: 1, 128>}, {pipeline_mode = #tpu.pipeline_mode<synchronous>, transform_indices = @transform_7, window_bounds = array<i64: 128, 16>}, {pipeline_mode = #tpu.pipeline_mode<synchronous>, transform_indices = @transform_8, window_bounds = array<i64: 1, 16>}, {pipeline_mode = #tpu.pipeline_mode<synchronous>, transform_indices = @transform_9, window_bounds = array<i64: 32, 128>}, {pipeline_mode = #tpu.pipeline_mode<synchronous>, transform_indices = @transform_10, window_bounds = array<i64: 32, 1>}, {pipeline_mode = #tpu.pipeline_mode<synchronous>, transform_indices = @transform_11, window_bounds = array<i64: 16, 128>}, {pipeline_mode = #tpu.pipeline_mode<synchronous>, transform_indices = @transform_12, window_bounds = array<i64: 1, 128>}, {pipeline_mode = #tpu.pipeline_mode<synchronous>, transform_indices = @transform_13, window_bounds = array<i64: 32, 128>}, {pipeline_mode = #tpu.pipeline_mode<synchronous>, transform_indices = @transform_14, window_bounds = array<i64: 32, 128>}, {pipeline_mode = #tpu.pipeline_mode<synchronous>, transform_indices = @transform_15, window_bounds = array<i64: 1, 128>}, {pipeline_mode = #tpu.pipeline_mode<synchronous>, transform_indices = @transform_16, window_bounds = array<i64: 128, 32>}, {pipeline_mode = #tpu.pipeline_mode<synchronous>, transform_indices = @transform_17, window_bounds = array<i64: 1, 32>}, {transform_indices = @transform_18, window_bounds = array<i64: 1, 8, 32>}]} {
    %c0 = arith.constant 0 : index
    %c0_0 = arith.constant 0 : index
    %c0_1 = arith.constant 0 : index
    %0 = vector.load %arg1[%c0, %c0_0, %c0_1] : memref<1x8x32xf32, #tpu.memory_space<vmem>>, vector<1x8x32xf32>
    %1 = vector.shape_cast %0 : vector<1x8x32xf32> to vector<8x32xf32>
    %c0_2 = arith.constant 0 : index
    %c0_3 = arith.constant 0 : index
    %2 = vector.load %arg2[%c0_2, %c0_3] : memref<1x32xf32, #tpu.memory_space<vmem>>, vector<1x32xf32>
    %c0_4 = arith.constant 0 : index
    %c0_5 = arith.constant 0 : index
    %3 = vector.load %arg3[%c0_4, %c0_5] : memref<1x32xf32, #tpu.memory_space<vmem>>, vector<1x32xf32>
    %cst = arith.constant dense<0.000000e+00> : vector<8xf32>
    %4 = vector.multi_reduction <add>, %1, %cst [1] : vector<8x32xf32> to vector<8xf32>
    %5 = vector.shape_cast %4 : vector<8xf32> to vector<8x1xf32>
    %cst_6 = arith.constant 3.200000e+01 : f32
    %6 = vector.broadcast %cst_6 : f32 to vector<8x1xf32>
    %7 = arith.divf %5, %6 : vector<8x1xf32>
    %8 = vector.broadcast %7 : vector<8x1xf32> to vector<8x32xf32>
    %9 = arith.subf %1, %8 : vector<8x32xf32>
    %10 = arith.mulf %9, %9 : vector<8x32xf32>
    %cst_7 = arith.constant dense<0.000000e+00> : vector<8xf32>
    %11 = vector.multi_reduction <add>, %10, %cst_7 [1] : vector<8x32xf32> to vector<8xf32>
    %12 = vector.shape_cast %11 : vector<8xf32> to vector<8x1xf32>
    %cst_8 = arith.constant 3.200000e+01 : f32
    %13 = vector.broadcast %cst_8 : f32 to vector<8x1xf32>
    %14 = arith.divf %12, %13 : vector<8x1xf32>
    %15 = vector.broadcast %7 : vector<8x1xf32> to vector<8x32xf32>
    %16 = arith.subf %1, %15 : vector<8x32xf32>
    %cst_9 = arith.constant 9.99999974E-6 : f32
    %17 = vector.broadcast %cst_9 : f32 to vector<8x1xf32>
    %18 = arith.addf %14, %17 : vector<8x1xf32>
    %19 = math.rsqrt %18 : vector<8x1xf32>
    %20 = vector.broadcast %19 : vector<8x1xf32> to vector<8x32xf32>
    %21 = arith.mulf %16, %20 : vector<8x32xf32>
    %22 = vector.broadcast %2 : vector<1x32xf32> to vector<8x32xf32>
    %23 = arith.mulf %21, %22 : vector<8x32xf32>
    %24 = vector.broadcast %3 : vector<1x32xf32> to vector<8x32xf32>
    %25 = arith.addf %23, %24 : vector<8x32xf32>
    %c0_10 = arith.constant 0 : index
    %c0_11 = arith.constant 0 : index
    %26 = vector.load %arg4[%c0_10, %c0_11] : memref<32x128xf32, #tpu.memory_space<vmem>>, vector<32x128xf32>
    %cst_12 = arith.constant dense<0.000000e+00> : vector<8x128xf32>
    %27 = tpu.matmul %25, %26, %cst_12 {dimension_numbers = #tpu.dot_dimension_numbers<[1], [0], [0], [1], [0, 0, 1, 1], [], []>} : vector<8x32xf32>, vector<32x128xf32>, vector<8x128xf32> -> vector<8x128xf32>
    %c0_13 = arith.constant 0 : index
    %c0_14 = arith.constant 0 : index
    %28 = vector.load %arg5[%c0_13, %c0_14] : memref<1x128xf32, #tpu.memory_space<vmem>>, vector<1x128xf32>
    %29 = vector.broadcast %28 : vector<1x128xf32> to vector<8x128xf32>
    %30 = arith.addf %27, %29 : vector<8x128xf32>
    %31 = tpu.iota {dimensions = array<i32: 0>} : vector<8x128xi32>
    %c0_i32 = arith.constant 0 : i32
    %32 = vector.broadcast %c0_i32 : i32 to vector<8x128xi32>
    %33 = arith.cmpi eq, %31, %32 : vector<8x128xi32>
    %c1_i32 = arith.constant 1 : i32
    %34 = tpu.dynamic_rotate %30 by %c1_i32 dim 0 : vector<8x128xf32>, i32 -> vector<8x128xf32>
    %cst_15 = arith.constant 0.000000e+00 : f32
    %35 = vector.broadcast %cst_15 : f32 to vector<8x128xf32>
    %36 = arith.select %33, %35, %34 : vector<8x128xi1>, vector<8x128xf32>
    %c7_i32 = arith.constant 7 : i32
    %37 = vector.broadcast %c7_i32 : i32 to vector<8x128xi32>
    %38 = arith.cmpi eq, %31, %37 : vector<8x128xi32>
    %c7_i32_16 = arith.constant 7 : i32
    %39 = tpu.dynamic_rotate %30 by %c7_i32_16 dim 0 : vector<8x128xf32>, i32 -> vector<8x128xf32>
    %cst_17 = arith.constant 0.000000e+00 : f32
    %40 = vector.broadcast %cst_17 : f32 to vector<8x128xf32>
    %41 = arith.select %38, %40, %39 : vector<8x128xi1>, vector<8x128xf32>
    %c0_18 = arith.constant 0 : index
    %c0_19 = arith.constant 0 : index
    %42 = vector.load %arg6[%c0_18, %c0_19] : memref<3x128xf32, #tpu.memory_space<vmem>>, vector<3x128xf32>
    %43 = vector.extract_strided_slice %42 {offsets = [0, 0], sizes = [1, 128], strides = [1, 1]} : vector<3x128xf32> to vector<1x128xf32>
    %44 = vector.broadcast %43 : vector<1x128xf32> to vector<8x128xf32>
    %45 = arith.mulf %36, %44 : vector<8x128xf32>
    %46 = vector.extract_strided_slice %42 {offsets = [1, 0], sizes = [1, 128], strides = [1, 1]} : vector<3x128xf32> to vector<1x128xf32>
    %47 = vector.broadcast %46 : vector<1x128xf32> to vector<8x128xf32>
    %48 = arith.mulf %30, %47 : vector<8x128xf32>
    %49 = arith.addf %45, %48 : vector<8x128xf32>
    %50 = vector.extract_strided_slice %42 {offsets = [2, 0], sizes = [1, 128], strides = [1, 1]} : vector<3x128xf32> to vector<1x128xf32>
    %51 = vector.broadcast %50 : vector<1x128xf32> to vector<8x128xf32>
    %52 = arith.mulf %41, %51 : vector<8x128xf32>
    %53 = arith.addf %49, %52 : vector<8x128xf32>
    %c0_20 = arith.constant 0 : index
    %c0_21 = arith.constant 0 : index
    %54 = vector.load %arg7[%c0_20, %c0_21] : memref<1x128xf32, #tpu.memory_space<vmem>>, vector<1x128xf32>
    %55 = vector.broadcast %54 : vector<1x128xf32> to vector<8x128xf32>
    %56 = arith.addf %53, %55 : vector<8x128xf32>
    %cst_22 = arith.constant 0.000000e+00 : f32
    %57 = vector.broadcast %cst_22 : f32 to vector<8x128xf32>
    %58 = arith.subf %57, %56 : vector<8x128xf32>
    %59 = math.exp %58 : vector<8x128xf32>
    %cst_23 = arith.constant 1.000000e+00 : f32
    %60 = vector.broadcast %cst_23 : f32 to vector<8x128xf32>
    %61 = arith.addf %60, %59 : vector<8x128xf32>
    %cst_24 = arith.constant 1.000000e+00 : f32
    %62 = vector.broadcast %cst_24 : f32 to vector<8x128xf32>
    %63 = arith.divf %62, %61 : vector<8x128xf32>
    %64 = arith.mulf %56, %63 : vector<8x128xf32>
    %c0_25 = arith.constant 0 : index
    %c0_26 = arith.constant 0 : index
    %65 = vector.load %arg8[%c0_25, %c0_26] : memref<128x16xf32, #tpu.memory_space<vmem>>, vector<128x16xf32>
    %cst_27 = arith.constant dense<0.000000e+00> : vector<8x16xf32>
    %66 = tpu.matmul %64, %65, %cst_27 {dimension_numbers = #tpu.dot_dimension_numbers<[1], [0], [0], [1], [0, 0, 1, 1], [], []>} : vector<8x128xf32>, vector<128x16xf32>, vector<8x16xf32> -> vector<8x16xf32>
    %c0_28 = arith.constant 0 : index
    %c0_29 = arith.constant 0 : index
    %67 = vector.load %arg9[%c0_28, %c0_29] : memref<1x16xf32, #tpu.memory_space<vmem>>, vector<1x16xf32>
    %68 = vector.broadcast %67 : vector<1x16xf32> to vector<8x16xf32>
    %69 = arith.addf %66, %68 : vector<8x16xf32>
    %c0_30 = arith.constant 0 : index
    %c0_31 = arith.constant 0 : index
    %70 = vector.load %arg12[%c0_30, %c0_31] : memref<16x128xf32, #tpu.memory_space<vmem>>, vector<16x128xf32>
    %cst_32 = arith.constant dense<0.000000e+00> : vector<8x128xf32>
    %71 = tpu.matmul %69, %70, %cst_32 {dimension_numbers = #tpu.dot_dimension_numbers<[1], [0], [0], [1], [0, 0, 1, 1], [], []>} : vector<8x16xf32>, vector<16x128xf32>, vector<8x128xf32> -> vector<8x128xf32>
    %c0_33 = arith.constant 0 : index
    %c0_34 = arith.constant 0 : index
    %72 = vector.load %arg13[%c0_33, %c0_34] : memref<1x128xf32, #tpu.memory_space<vmem>>, vector<1x128xf32>
    %73 = vector.broadcast %72 : vector<1x128xf32> to vector<8x128xf32>
    %74 = arith.addf %71, %73 : vector<8x128xf32>
    %cst_35 = arith.constant 0.000000e+00 : f32
    %75 = vector.broadcast %cst_35 : f32 to vector<8x128xf32>
    %76 = arith.maximumf %74, %75 : vector<8x128xf32>
    %77 = math.absf %74 : vector<8x128xf32>
    %cst_36 = arith.constant 0.000000e+00 : f32
    %78 = vector.broadcast %cst_36 : f32 to vector<8x128xf32>
    %79 = arith.subf %78, %77 : vector<8x128xf32>
    %80 = math.exp %79 : vector<8x128xf32>
    %81 = math.log1p %80 : vector<8x128xf32>
    %82 = arith.addf %76, %81 : vector<8x128xf32>
    %c0_37 = arith.constant 0 : index
    %c0_38 = arith.constant 0 : index
    %83 = vector.load %arg10[%c0_37, %c0_38] : memref<32x128xf32, #tpu.memory_space<vmem>>, vector<32x128xf32>
    %cst_39 = arith.constant dense<0.000000e+00> : vector<32x8xf32>
    %84 = tpu.matmul %83, %64, %cst_39 {dimension_numbers = #tpu.dot_dimension_numbers<[1], [1], [0], [0], [0, 0, 1, 0], [], []>} : vector<32x128xf32>, vector<8x128xf32>, vector<32x8xf32> -> vector<32x8xf32>
    %c0_40 = arith.constant 0 : index
    %c0_41 = arith.constant 0 : index
    %85 = vector.load %arg11[%c0_40, %c0_41] : memref<32x1xf32, #tpu.memory_space<vmem>>, vector<32x1xf32>
    %86 = vector.broadcast %85 : vector<32x1xf32> to vector<32x8xf32>
    %87 = arith.addf %84, %86 : vector<32x8xf32>
    %c0_42 = arith.constant 0 : index
    %c0_43 = arith.constant 0 : index
    %88 = vector.load %arg14[%c0_42, %c0_43] : memref<32x128xf32, #tpu.memory_space<vmem>>, vector<32x128xf32>
    %c0_44 = arith.constant 0 : index
    %c0_45 = arith.constant 0 : index
    %89 = vector.load %arg15[%c0_44, %c0_45] : memref<32x128xf32, #tpu.memory_space<vmem>>, vector<32x128xf32>
    %90 = arith.mulf %82, %64 : vector<8x128xf32>
    %91 = vector.extract_strided_slice %82 {offsets = [0, 0], sizes = [1, 128], strides = [1, 1]} : vector<8x128xf32> to vector<1x128xf32>
    %92 = vector.broadcast %91 : vector<1x128xf32> to vector<32x128xf32>
    %93 = arith.mulf %92, %88 : vector<32x128xf32>
    %94 = math.exp %93 : vector<32x128xf32>
    %95 = vector.extract_strided_slice %82 {offsets = [1, 0], sizes = [1, 128], strides = [1, 1]} : vector<8x128xf32> to vector<1x128xf32>
    %96 = vector.broadcast %95 : vector<1x128xf32> to vector<32x128xf32>
    %97 = arith.mulf %96, %88 : vector<32x128xf32>
    %98 = math.exp %97 : vector<32x128xf32>
    %99 = vector.extract_strided_slice %82 {offsets = [2, 0], sizes = [1, 128], strides = [1, 1]} : vector<8x128xf32> to vector<1x128xf32>
    %100 = vector.broadcast %99 : vector<1x128xf32> to vector<32x128xf32>
    %101 = arith.mulf %100, %88 : vector<32x128xf32>
    %102 = math.exp %101 : vector<32x128xf32>
    %103 = vector.extract_strided_slice %82 {offsets = [3, 0], sizes = [1, 128], strides = [1, 1]} : vector<8x128xf32> to vector<1x128xf32>
    %104 = vector.broadcast %103 : vector<1x128xf32> to vector<32x128xf32>
    %105 = arith.mulf %104, %88 : vector<32x128xf32>
    %106 = math.exp %105 : vector<32x128xf32>
    %107 = vector.extract_strided_slice %82 {offsets = [4, 0], sizes = [1, 128], strides = [1, 1]} : vector<8x128xf32> to vector<1x128xf32>
    %108 = vector.broadcast %107 : vector<1x128xf32> to vector<32x128xf32>
    %109 = arith.mulf %108, %88 : vector<32x128xf32>
    %110 = math.exp %109 : vector<32x128xf32>
    %111 = vector.extract_strided_slice %82 {offsets = [5, 0], sizes = [1, 128], strides = [1, 1]} : vector<8x128xf32> to vector<1x128xf32>
    %112 = vector.broadcast %111 : vector<1x128xf32> to vector<32x128xf32>
    %113 = arith.mulf %112, %88 : vector<32x128xf32>
    %114 = math.exp %113 : vector<32x128xf32>
    %115 = vector.extract_strided_slice %82 {offsets = [6, 0], sizes = [1, 128], strides = [1, 1]} : vector<8x128xf32> to vector<1x128xf32>
    %116 = vector.broadcast %115 : vector<1x128xf32> to vector<32x128xf32>
    %117 = arith.mulf %116, %88 : vector<32x128xf32>
    %118 = math.exp %117 : vector<32x128xf32>
    %119 = vector.extract_strided_slice %82 {offsets = [7, 0], sizes = [1, 128], strides = [1, 1]} : vector<8x128xf32> to vector<1x128xf32>
    %120 = vector.broadcast %119 : vector<1x128xf32> to vector<32x128xf32>
    %121 = arith.mulf %120, %88 : vector<32x128xf32>
    %122 = math.exp %121 : vector<32x128xf32>
    %123 = vector.extract_strided_slice %90 {offsets = [0, 0], sizes = [1, 128], strides = [1, 1]} : vector<8x128xf32> to vector<1x128xf32>
    %124 = vector.extract_strided_slice %87 {offsets = [0, 0], sizes = [32, 1], strides = [1, 1]} : vector<32x8xf32> to vector<32x1xf32>
    %125 = vector.broadcast %123 : vector<1x128xf32> to vector<32x128xf32>
    %126 = vector.broadcast %124 : vector<32x1xf32> to vector<32x128xf32>
    %127 = arith.mulf %125, %126 : vector<32x128xf32>
    %128 = arith.mulf %127, %89 : vector<32x128xf32>
    %129 = vector.extract_strided_slice %90 {offsets = [1, 0], sizes = [1, 128], strides = [1, 1]} : vector<8x128xf32> to vector<1x128xf32>
    %130 = vector.extract_strided_slice %87 {offsets = [0, 1], sizes = [32, 1], strides = [1, 1]} : vector<32x8xf32> to vector<32x1xf32>
    %131 = vector.broadcast %129 : vector<1x128xf32> to vector<32x128xf32>
    %132 = vector.broadcast %130 : vector<32x1xf32> to vector<32x128xf32>
    %133 = arith.mulf %131, %132 : vector<32x128xf32>
    %134 = arith.mulf %133, %89 : vector<32x128xf32>
    %135 = vector.extract_strided_slice %90 {offsets = [2, 0], sizes = [1, 128], strides = [1, 1]} : vector<8x128xf32> to vector<1x128xf32>
    %136 = vector.extract_strided_slice %87 {offsets = [0, 2], sizes = [32, 1], strides = [1, 1]} : vector<32x8xf32> to vector<32x1xf32>
    %137 = vector.broadcast %135 : vector<1x128xf32> to vector<32x128xf32>
    %138 = vector.broadcast %136 : vector<32x1xf32> to vector<32x128xf32>
    %139 = arith.mulf %137, %138 : vector<32x128xf32>
    %140 = arith.mulf %139, %89 : vector<32x128xf32>
    %141 = vector.extract_strided_slice %90 {offsets = [3, 0], sizes = [1, 128], strides = [1, 1]} : vector<8x128xf32> to vector<1x128xf32>
    %142 = vector.extract_strided_slice %87 {offsets = [0, 3], sizes = [32, 1], strides = [1, 1]} : vector<32x8xf32> to vector<32x1xf32>
    %143 = vector.broadcast %141 : vector<1x128xf32> to vector<32x128xf32>
    %144 = vector.broadcast %142 : vector<32x1xf32> to vector<32x128xf32>
    %145 = arith.mulf %143, %144 : vector<32x128xf32>
    %146 = arith.mulf %145, %89 : vector<32x128xf32>
    %147 = vector.extract_strided_slice %90 {offsets = [4, 0], sizes = [1, 128], strides = [1, 1]} : vector<8x128xf32> to vector<1x128xf32>
    %148 = vector.extract_strided_slice %87 {offsets = [0, 4], sizes = [32, 1], strides = [1, 1]} : vector<32x8xf32> to vector<32x1xf32>
    %149 = vector.broadcast %147 : vector<1x128xf32> to vector<32x128xf32>
    %150 = vector.broadcast %148 : vector<32x1xf32> to vector<32x128xf32>
    %151 = arith.mulf %149, %150 : vector<32x128xf32>
    %152 = arith.mulf %151, %89 : vector<32x128xf32>
    %153 = vector.extract_strided_slice %90 {offsets = [5, 0], sizes = [1, 128], strides = [1, 1]} : vector<8x128xf32> to vector<1x128xf32>
    %154 = vector.extract_strided_slice %87 {offsets = [0, 5], sizes = [32, 1], strides = [1, 1]} : vector<32x8xf32> to vector<32x1xf32>
    %155 = vector.broadcast %153 : vector<1x128xf32> to vector<32x128xf32>
    %156 = vector.broadcast %154 : vector<32x1xf32> to vector<32x128xf32>
    %157 = arith.mulf %155, %156 : vector<32x128xf32>
    %158 = arith.mulf %157, %89 : vector<32x128xf32>
    %159 = vector.extract_strided_slice %90 {offsets = [6, 0], sizes = [1, 128], strides = [1, 1]} : vector<8x128xf32> to vector<1x128xf32>
    %160 = vector.extract_strided_slice %87 {offsets = [0, 6], sizes = [32, 1], strides = [1, 1]} : vector<32x8xf32> to vector<32x1xf32>
    %161 = vector.broadcast %159 : vector<1x128xf32> to vector<32x128xf32>
    %162 = vector.broadcast %160 : vector<32x1xf32> to vector<32x128xf32>
    %163 = arith.mulf %161, %162 : vector<32x128xf32>
    %164 = arith.mulf %163, %89 : vector<32x128xf32>
    %165 = vector.extract_strided_slice %90 {offsets = [7, 0], sizes = [1, 128], strides = [1, 1]} : vector<8x128xf32> to vector<1x128xf32>
    %166 = vector.extract_strided_slice %87 {offsets = [0, 7], sizes = [32, 1], strides = [1, 1]} : vector<32x8xf32> to vector<32x1xf32>
    %167 = vector.broadcast %165 : vector<1x128xf32> to vector<32x128xf32>
    %168 = vector.broadcast %166 : vector<32x1xf32> to vector<32x128xf32>
    %169 = arith.mulf %167, %168 : vector<32x128xf32>
    %170 = arith.mulf %169, %89 : vector<32x128xf32>
    %cst_46 = arith.constant 0.000000e+00 : f32
    %171 = vector.broadcast %cst_46 : f32 to vector<32x128xf32>
    %172 = arith.mulf %94, %171 : vector<32x128xf32>
    %173 = arith.addf %172, %128 : vector<32x128xf32>
    %cst_47 = arith.constant dense<0.000000e+00> : vector<128xf32>
    %174 = vector.multi_reduction <add>, %173, %cst_47 [0] : vector<32x128xf32> to vector<128xf32>
    %175 = vector.shape_cast %174 : vector<128xf32> to vector<1x128xf32>
    %c0_48 = arith.constant 0 : index
    %c0_49 = arith.constant 0 : index
    %176 = vector.load %arg20[%c0_48, %c0_49] : memref<8x128xf32, #tpu.memory_space<vmem>>, vector<1x128xf32>
    tpu.vector_store %arg20[%c0_48, %c0_49], %175 {strides = array<i32>} : memref<8x128xf32, #tpu.memory_space<vmem>>, vector<1x128xf32>,
    %177 = arith.mulf %98, %173 : vector<32x128xf32>
    %178 = arith.addf %177, %134 : vector<32x128xf32>
    %cst_50 = arith.constant dense<0.000000e+00> : vector<128xf32>
    %179 = vector.multi_reduction <add>, %178, %cst_50 [0] : vector<32x128xf32> to vector<128xf32>
    %180 = vector.shape_cast %179 : vector<128xf32> to vector<1x128xf32>
    %c1 = arith.constant 1 : index
    %c0_51 = arith.constant 0 : index
    %181 = vector.load %arg20[%c1, %c0_51] : memref<8x128xf32, #tpu.memory_space<vmem>>, vector<1x128xf32>
    tpu.vector_store %arg20[%c1, %c0_51], %180 {strides = array<i32>} : memref<8x128xf32, #tpu.memory_space<vmem>>, vector<1x128xf32>,
    %182 = arith.mulf %102, %178 : vector<32x128xf32>
    %183 = arith.addf %182, %140 : vector<32x128xf32>
    %cst_52 = arith.constant dense<0.000000e+00> : vector<128xf32>
    %184 = vector.multi_reduction <add>, %183, %cst_52 [0] : vector<32x128xf32> to vector<128xf32>
    %185 = vector.shape_cast %184 : vector<128xf32> to vector<1x128xf32>
    %c2 = arith.constant 2 : index
    %c0_53 = arith.constant 0 : index
    %186 = vector.load %arg20[%c2, %c0_53] : memref<8x128xf32, #tpu.memory_space<vmem>>, vector<1x128xf32>
    tpu.vector_store %arg20[%c2, %c0_53], %185 {strides = array<i32>} : memref<8x128xf32, #tpu.memory_space<vmem>>, vector<1x128xf32>,
    %187 = arith.mulf %106, %183 : vector<32x128xf32>
    %188 = arith.addf %187, %146 : vector<32x128xf32>
    %cst_54 = arith.constant dense<0.000000e+00> : vector<128xf32>
    %189 = vector.multi_reduction <add>, %188, %cst_54 [0] : vector<32x128xf32> to vector<128xf32>
    %190 = vector.shape_cast %189 : vector<128xf32> to vector<1x128xf32>
    %c3 = arith.constant 3 : index
    %c0_55 = arith.constant 0 : index
    %191 = vector.load %arg20[%c3, %c0_55] : memref<8x128xf32, #tpu.memory_space<vmem>>, vector<1x128xf32>
    tpu.vector_store %arg20[%c3, %c0_55], %190 {strides = array<i32>} : memref<8x128xf32, #tpu.memory_space<vmem>>, vector<1x128xf32>,
    %192 = arith.mulf %110, %188 : vector<32x128xf32>
    %193 = arith.addf %192, %152 : vector<32x128xf32>
    %cst_56 = arith.constant dense<0.000000e+00> : vector<128xf32>
    %194 = vector.multi_reduction <add>, %193, %cst_56 [0] : vector<32x128xf32> to vector<128xf32>
    %195 = vector.shape_cast %194 : vector<128xf32> to vector<1x128xf32>
    %c4 = arith.constant 4 : index
    %c0_57 = arith.constant 0 : index
    %196 = vector.load %arg20[%c4, %c0_57] : memref<8x128xf32, #tpu.memory_space<vmem>>, vector<1x128xf32>
    tpu.vector_store %arg20[%c4, %c0_57], %195 {strides = array<i32>} : memref<8x128xf32, #tpu.memory_space<vmem>>, vector<1x128xf32>,
    %197 = arith.mulf %114, %193 : vector<32x128xf32>
    %198 = arith.addf %197, %158 : vector<32x128xf32>
    %cst_58 = arith.constant dense<0.000000e+00> : vector<128xf32>
    %199 = vector.multi_reduction <add>, %198, %cst_58 [0] : vector<32x128xf32> to vector<128xf32>
    %200 = vector.shape_cast %199 : vector<128xf32> to vector<1x128xf32>
    %c5 = arith.constant 5 : index
    %c0_59 = arith.constant 0 : index
    %201 = vector.load %arg20[%c5, %c0_59] : memref<8x128xf32, #tpu.memory_space<vmem>>, vector<1x128xf32>
    tpu.vector_store %arg20[%c5, %c0_59], %200 {strides = array<i32>} : memref<8x128xf32, #tpu.memory_space<vmem>>, vector<1x128xf32>,
    %202 = arith.mulf %118, %198 : vector<32x128xf32>
    %203 = arith.addf %202, %164 : vector<32x128xf32>
    %cst_60 = arith.constant dense<0.000000e+00> : vector<128xf32>
    %204 = vector.multi_reduction <add>, %203, %cst_60 [0] : vector<32x128xf32> to vector<128xf32>
    %205 = vector.shape_cast %204 : vector<128xf32> to vector<1x128xf32>
    %c6 = arith.constant 6 : index
    %c0_61 = arith.constant 0 : index
    %206 = vector.load %arg20[%c6, %c0_61] : memref<8x128xf32, #tpu.memory_space<vmem>>, vector<1x128xf32>
    tpu.vector_store %arg20[%c6, %c0_61], %205 {strides = array<i32>} : memref<8x128xf32, #tpu.memory_space<vmem>>, vector<1x128xf32>,
    %207 = arith.mulf %122, %203 : vector<32x128xf32>
    %208 = arith.addf %207, %170 : vector<32x128xf32>
    %cst_62 = arith.constant dense<0.000000e+00> : vector<128xf32>
    %209 = vector.multi_reduction <add>, %208, %cst_62 [0] : vector<32x128xf32> to vector<128xf32>
    %210 = vector.shape_cast %209 : vector<128xf32> to vector<1x128xf32>
    %c7 = arith.constant 7 : index
    %c0_63 = arith.constant 0 : index
    %211 = vector.load %arg20[%c7, %c0_63] : memref<8x128xf32, #tpu.memory_space<vmem>>, vector<1x128xf32>
    tpu.vector_store %arg20[%c7, %c0_63], %210 {strides = array<i32>} : memref<8x128xf32, #tpu.memory_space<vmem>>, vector<1x128xf32>,
    %c0_64 = arith.constant 0 : index
    %c0_65 = arith.constant 0 : index
    %212 = vector.load %arg20[%c0_64, %c0_65] : memref<8x128xf32, #tpu.memory_space<vmem>>, vector<8x128xf32>
    %c0_66 = arith.constant 0 : index
    %c0_67 = arith.constant 0 : index
    %213 = vector.load %arg16[%c0_66, %c0_67] : memref<1x128xf32, #tpu.memory_space<vmem>>, vector<1x128xf32>
    %214 = vector.broadcast %213 : vector<1x128xf32> to vector<8x128xf32>
    %215 = arith.mulf %64, %214 : vector<8x128xf32>
    %216 = arith.addf %212, %215 : vector<8x128xf32>
    %c0_68 = arith.constant 0 : index
    %c0_69 = arith.constant 0 : index
    %217 = vector.load %arg17[%c0_68, %c0_69] : memref<128x32xf32, #tpu.memory_space<vmem>>, vector<128x32xf32>
    %cst_70 = arith.constant dense<0.000000e+00> : vector<8x32xf32>
    %218 = tpu.matmul %216, %217, %cst_70 {dimension_numbers = #tpu.dot_dimension_numbers<[1], [0], [0], [1], [0, 0, 1, 1], [], []>} : vector<8x128xf32>, vector<128x32xf32>, vector<8x32xf32> -> vector<8x32xf32>
    %c0_71 = arith.constant 0 : index
    %c0_72 = arith.constant 0 : index
    %219 = vector.load %arg18[%c0_71, %c0_72] : memref<1x32xf32, #tpu.memory_space<vmem>>, vector<1x32xf32>
    %220 = vector.broadcast %219 : vector<1x32xf32> to vector<8x32xf32>
    %221 = arith.addf %218, %220 : vector<8x32xf32>
    %cst_73 = arith.constant 5.000000e-01 : f32
    %222 = vector.broadcast %cst_73 : f32 to vector<8x32xf32>
    %223 = arith.mulf %221, %222 : vector<8x32xf32>
    %c0_74 = arith.constant 0 : index
    %c0_75 = arith.constant 0 : index
    %c0_76 = arith.constant 0 : index
    %224 = vector.load %arg19[%c0_74, %c0_75, %c0_76] : memref<1x8x32xf32, #tpu.memory_space<vmem>>, vector<1x8x32xf32>
    %225 = vector.shape_cast %224 : vector<1x8x32xf32> to vector<8x32xf32>
    %226 = vector.shape_cast %223 : vector<8x32xf32> to vector<1x8x32xf32>
    tpu.vector_store %arg19[%c0_74, %c0_75, %c0_76], %226 {strides = array<i32>} : memref<1x8x32xf32, #tpu.memory_space<vmem>>, vector<1x8x32xf32>,
    return
  }
  func.func @transform_0(%arg0: i32) -> (i32, i32, i32) {
    %c0_i32 = arith.constant 0 : i32
    %c0_i32_0 = arith.constant 0 : i32
    %c0_i32_1 = arith.constant 0 : i32
    return %arg0, %c0_i32, %c0_i32_0 : i32, i32, i32
  }
  func.func @transform_1(%arg0: i32) -> (i32, i32) {
    %c0_i32 = arith.constant 0 : i32
    %c0_i32_0 = arith.constant 0 : i32
    %c0_i32_1 = arith.constant 0 : i32
    return %c0_i32, %c0_i32_0 : i32, i32
  }
  func.func @transform_2(%arg0: i32) -> (i32, i32) {
    %c0_i32 = arith.constant 0 : i32
    %c0_i32_0 = arith.constant 0 : i32
    %c0_i32_1 = arith.constant 0 : i32
    return %c0_i32, %c0_i32_0 : i32, i32
  }
  func.func @transform_3(%arg0: i32) -> (i32, i32) {
    %c0_i32 = arith.constant 0 : i32
    %c0_i32_0 = arith.constant 0 : i32
    %c0_i32_1 = arith.constant 0 : i32
    return %c0_i32, %c0_i32_0 : i32, i32
  }
  func.func @transform_4(%arg0: i32) -> (i32, i32) {
    %c0_i32 = arith.constant 0 : i32
    %c0_i32_0 = arith.constant 0 : i32
    %c0_i32_1 = arith.constant 0 : i32
    return %c0_i32, %c0_i32_0 : i32, i32
  }
  func.func @transform_5(%arg0: i32) -> (i32, i32) {
    %c0_i32 = arith.constant 0 : i32
    %c0_i32_0 = arith.constant 0 : i32
    %c0_i32_1 = arith.constant 0 : i32
    return %c0_i32, %c0_i32_0 : i32, i32
  }
  func.func @transform_6(%arg0: i32) -> (i32, i32) {
    %c0_i32 = arith.constant 0 : i32
    %c0_i32_0 = arith.constant 0 : i32
    %c0_i32_1 = arith.constant 0 : i32
    return %c0_i32, %c0_i32_0 : i32, i32
  }
  func.func @transform_7(%arg0: i32) -> (i32, i32) {
    %c0_i32 = arith.constant 0 : i32
    %c0_i32_0 = arith.constant 0 : i32
    %c0_i32_1 = arith.constant 0 : i32
    return %c0_i32, %c0_i32_0 : i32, i32
  }
  func.func @transform_8(%arg0: i32) -> (i32, i32) {
    %c0_i32 = arith.constant 0 : i32
    %c0_i32_0 = arith.constant 0 : i32
    %c0_i32_1 = arith.constant 0 : i32
    return %c0_i32, %c0_i32_0 : i32, i32
  }
  func.func @transform_9(%arg0: i32) -> (i32, i32) {
    %c0_i32 = arith.constant 0 : i32
    %c0_i32_0 = arith.constant 0 : i32
    %c0_i32_1 = arith.constant 0 : i32
    return %c0_i32, %c0_i32_0 : i32, i32
  }
  func.func @transform_10(%arg0: i32) -> (i32, i32) {
    %c0_i32 = arith.constant 0 : i32
    %c0_i32_0 = arith.constant 0 : i32
    %c0_i32_1 = arith.constant 0 : i32
    return %c0_i32, %c0_i32_0 : i32, i32
  }
  func.func @transform_11(%arg0: i32) -> (i32, i32) {
    %c0_i32 = arith.constant 0 : i32
    %c0_i32_0 = arith.constant 0 : i32
    %c0_i32_1 = arith.constant 0 : i32
    return %c0_i32, %c0_i32_0 : i32, i32
  }
  func.func @transform_12(%arg0: i32) -> (i32, i32) {
    %c0_i32 = arith.constant 0 : i32
    %c0_i32_0 = arith.constant 0 : i32
    %c0_i32_1 = arith.constant 0 : i32
    return %c0_i32, %c0_i32_0 : i32, i32
  }
  func.func @transform_13(%arg0: i32) -> (i32, i32) {
    %c0_i32 = arith.constant 0 : i32
    %c0_i32_0 = arith.constant 0 : i32
    %c0_i32_1 = arith.constant 0 : i32
    return %c0_i32, %c0_i32_0 : i32, i32
  }
  func.func @transform_14(%arg0: i32) -> (i32, i32) {
    %c0_i32 = arith.constant 0 : i32
    %c0_i32_0 = arith.constant 0 : i32
    %c0_i32_1 = arith.constant 0 : i32
    return %c0_i32, %c0_i32_0 : i32, i32
  }
  func.func @transform_15(%arg0: i32) -> (i32, i32) {
    %c0_i32 = arith.constant 0 : i32
    %c0_i32_0 = arith.constant 0 : i32
    %c0_i32_1 = arith.constant 0 : i32
    return %c0_i32, %c0_i32_0 : i32, i32
  }
  func.func @transform_16(%arg0: i32) -> (i32, i32) {
    %c0_i32 = arith.constant 0 : i32
    %c0_i32_0 = arith.constant 0 : i32
    %c0_i32_1 = arith.constant 0 : i32
    return %c0_i32, %c0_i32_0 : i32, i32
  }
  func.func @transform_17(%arg0: i32) -> (i32, i32) {
    %c0_i32 = arith.constant 0 : i32
    %c0_i32_0 = arith.constant 0 : i32
    %c0_i32_1 = arith.constant 0 : i32
    return %c0_i32, %c0_i32_0 : i32, i32
  }
  func.func @transform_18(%arg0: i32) -> (i32, i32, i32) {
    %c0_i32 = arith.constant 0 : i32
    %c0_i32_0 = arith.constant 0 : i32
    %c0_i32_1 = arith.constant 0 : i32
    return %arg0, %c0_i32, %c0_i32_0 : i32, i32, i32
  }
}

</mosaic_0001>

<bundles_post_ra>
// kernel: sequence_to_vector.9
= control target key start
LH: loop header
LB: loop body
LE: loop exit
PB: predicated region body
PF: predicated region fallthrough
CT: control target
= control target key end

     0   :  { %vm24_vm0 = vcmask 261120   ;;  %s416_s0 = inlined_call_operand.vmem [shape: f32[2,8,32], index: 0, kind: input, shape index: {}]   ;;  %s417_s1 = inlined_call_operand.vmem [shape: f32[1,32], index: 1, kind: input, shape index: {}]   ;;  %s418_s2 = inlined_call_operand.vmem [shape: f32[1,32], index: 2, kind: input, shape index: {}]   ;;  %s419_s3 = inlined_call_operand.vmem [shape: f32[32,64], index: 3, kind: input, shape index: {}]   ;;  %s420_s4 = inlined_call_operand.vmem [shape: f32[1,64], index: 4, kind: input, shape index: {}]   ;;  %s421_s5 = inlined_call_operand.hbm [shape: f32[2,64], index: 5, kind: output, shape index: {}]  }
   0x1   :  { %v21_v0 = vld [vmem:[%s416_s0] sm:$0xff]  ;;  %v277_v1 = vld [vmem:[%s416_s0 + $0x8] sm:$0xff] }
   0x2   :  { %10 = vsyncpa [#allocation3], 0  ;;  %v25_v2 = vsel %vm24_vm0, %v21_v0, 0.0  ;;  %v146_v3 = vsel %vm24_vm0, %v277_v1, 0.0  ;;  %v65_v14 = vld [vmem:[%s419_s3 + $0x18] sm:$0xff]  ;;  %v342_v15 = vmov 0.0  }
   0x3   :  { %26 = vadd.xlane.f32.xlu0 %v25_v2  ;;  %291 = vmatprep.subr.mxu0 %v342_v15  ;;  %v64_v16 = vld [vmem:[%s419_s3 + $0x10] sm:$0xff]  ;;  %v63_v17 = vld [vmem:[%s419_s3 + $0x8] sm:$0xff]  ;;  %vm343_vm1 = vmmov 0   ;;  %v62_v18 = vld [vmem:[%s419_s3] sm:$0xff]  ;;  %vm140_vm2 = vcmask 516096   ;;  %s344_s9 = smov [#allocation2]  }
   0x4   :  { %302 = vmatprep.subr.mxu1 %v342_v15  ;;  %292 = vmatpush3.msra.mxu0 %v65_v14  ;;  %v278_v26 = vld [vmem:[%s417_s1] ss:$0 sm:$0xff]  ;;  %s266_s10 = sshll.u32 %s344_s9, 4  ;;  %s267_s10 = int_to_ptr.vmem [resolvable:$true] %s266_s10 }
   0x5   :  { %303 = vmatpush3.msra.mxu1 %v65_v14  ;;  %293 = vmatprep.subr.mxu0 %v342_v15  ;;  %v275_v28 = vld [vmem:[%s418_s2] ss:$0 sm:$0xff]  ;;  %s320_s11 = scalar_lea.vmem %s267_s10, 32  ;;  %p325_p1 = scmp.lt.s32.totalorder %s267_s10, %s267_s10 }
   0x6   :  { %304 = vmatprep.subr.mxu1 %v342_v15  ;;  %294 = vmatpush3.msra.mxu0 %v64_v16  ;;  %v66_v51 = vld [vmem:[%s420_s4] sm:$0x1]  ;;  %p321_p0 = scmp.ne.s32.totalorder %s267_s10, %s320_s11  ;;  %p326_p2 = scmp.lt.s32.totalorder %s320_s11, %s320_s11 }
   0x7   :  { %147 = vadd.xlane.f32.xlu0 %v146_v3  ;;  %299 = vmatprep.mubr.msk.f32.mxu0 %vm343_vm1, %v342_v15  ;;  %v185_v55 = vld [vmem:[%s420_s4] sm:$0x1] }
   0x8   :  { %295 = vmatprep.subr.mxu0 %v342_v15  ;;  %305 = vmatpush3.msra.mxu1 %v64_v16  ;;  %p327_p3 = por %p326_p2, %p325_p1 }
   0x9   :  { %296 = vmatpush3.msra.mxu0 %v63_v17  ;;  %306 = vmatprep.subr.mxu1 %v342_v15 }
   0xa   :  { %297 = vmatprep.subr.mxu0 %v342_v15  ;;  %307 = vmatpush3.msra.mxu1 %v63_v17  ;;  %p328_p4 = pnand %p327_p3, %p321_p0 }
   0xb   :  { %298 = vmatpush3.msra.mxu0 %v62_v18  ;;  %308 = vmatprep.subr.mxu1 %v342_v15 }
   0xc   :  { %309 = vmatpush3.msra.mxu1 %v62_v18  ;;  %310 = vmatprep.mubr.msk.f32.mxu1 %vm343_vm1, %v342_v15 }
  0x8c   :  { %v27_v4 = vpop.xlane.xlu0 %26 }
  0x8d   :  { %v29_v5 = vmul.f32 0.03125, %v27_v4 }
  0x8f   :  { %v30_v6 = vsub.f32 %v21_v0, %v29_v5 }
  0x90   :  { %v148_v7 = vpop.xlane.xlu0 %147 }
  0x91   :  { %v149_v8 = vmul.f32 0.03125, %v148_v7  ;;  %v31_v9 = vmul.f32 %v30_v6, %v30_v6 }
  0x93   :  { %v150_v10 = vsub.f32 %v277_v1, %v149_v8  ;;  %v32_v11 = vsel %vm24_vm0, %v31_v9, 0.0 }
  0x94   :  { %33 = vadd.xlane.f32.xlu1 %v32_v11 }
  0x95   :  { %v151_v12 = vmul.f32 %v150_v10, %v150_v10 }
  0x97   :  { %v152_v13 = vsel %vm24_vm0, %v151_v12, 0.0 }
  0x98   :  { %153 = vadd.xlane.f32.xlu1 %v152_v13 }
 0x11d   :  { %v34_v19 = vpop.xlane.xlu1 %33 }
 0x11e   :  { %v35_v20 = vmul.f32 0.03125, %v34_v19 }
 0x120   :  { %v36_v21 = vadd.f32 1e-05, %v35_v20 }
 0x121   :  { %v154_v22 = vpop.xlane.xlu1 %153 }
 0x122   :  { %316 = vrsqrt.f32 %v36_v21  ;;  %v155_v23 = vmul.f32 0.03125, %v154_v22 }
 0x124   :  { %v156_v24 = vadd.f32 1e-05, %v155_v23 }
 0x126   :  { %318 = vrsqrt.f32 %v156_v24 }
 0x12f   :  { %v317_v25 = vpop.eup %316 }
 0x130   :  { %v38_v27 = vmul.f32 %v317_v25, %v30_v6 }
 0x132   :  { %v45_v29 = vmul.f32 %v278_v26, %v38_v27 }
 0x133   :  { %v319_v30 = vpop.eup %318 }
 0x134   :  { %v158_v31 = vmul.f32 %v319_v30, %v150_v10  ;;  %v52_v32 = vadd.f32 %v275_v28, %v45_v29 }
 0x136   :  { %v165_v33 = vmul.f32 %v278_v26, %v158_v31  ;;  %v53_v34 = vsel %vm24_vm0, %v52_v32, 0.0 }
 0x137   :  { %v54_v35 = vrot.slane %v53_v34, 4 }
 0x138   :  { %v172_v36 = vadd.f32 %v275_v28, %v165_v33 }
 0x139   :  { %v55_v37 = vadd.f32 %v54_v35, %v53_v34 }
 0x13a   :  { %v173_v38 = vsel %vm24_vm0, %v172_v36, 0.0 }
 0x13b   :  { %v56_v39 = vrot.slane %v55_v37, 2  ;;  %v174_v40 = vrot.slane %v173_v38, 4 }
 0x13d   :  { %v57_v41 = vadd.f32 %v56_v39, %v55_v37  ;;  %v175_v42 = vadd.f32 %v174_v40, %v173_v38 }
 0x13f   :  { %v58_v43 = vrot.slane %v57_v41, 1  ;;  %v176_v44 = vrot.slane %v175_v42, 2 }
 0x141   :  { %v59_v45 = vadd.f32 %v58_v43, %v57_v41  ;;  %v177_v46 = vadd.f32 %v176_v44, %v175_v42 }
 0x143   :  { %v61_v47 = vmul.f32 0.125, %v59_v45  ;;  %v178_v48 = vrot.slane %v177_v46, 1 }
 0x145   :  { %300 = vmatmul.mubr.msk.f32.vlgmr.msra.gmra.mxu0 %vm24_vm0, %v61_v47  ;;  %v179_v49 = vadd.f32 %v178_v48, %v177_v46 }
 0x147   :  { %v180_v50 = vmul.f32 0.125, %v179_v49 }
 0x149   :  { %311 = vmatmul.mubr.msk.f32.vlgmr.msra.gmra.mxu1 %vm24_vm0, %v180_v50 }
 0x205   :  { %v136_v52 = vpop.f32.mrf.mxu0 }
 0x206   :  { %v137_v53 = vadd.f32 %v136_v52, %v66_v51 }
 0x207   :  { %v301_v54 = vpop.f32.mrf.mxu0 }
 0x208   :  { %141 = vst.msk [vmem:[#allocation2] sm:$0x1] %vm140_vm2, %v137_v53 }
 0x209   :  { %v255_v56 = vpop.f32.mrf.mxu1 }
 0x20a   :  { %v256_v57 = vadd.f32 %v255_v56, %v185_v55 }
 0x20b   :  { %v312_v58 = vpop.f32.mrf.mxu1 }
 0x20c   :  { %259 = vst.msk [vmem:[#allocation2 + $0x1] sm:$0x1] %vm140_vm2, %v256_v57 }
 0x20d   :  { %331 = shalt.err (!%p328_p4)
}
 0x20e   :  { %269 = dma.vmem_to_hbm [thread:$0]  %s267_s10, 32, %s421_s5, [#allocation3]  }
 0x20f   :  { %340 = dma.done.wait [#allocation3], 32  }
 0x210   :  { %341 = vsyncadd [#allocation3], 4294967264 }
 0x211   :  { %273 = vsyncpa [#allocation3], 1 }

// kernel: sequence_to_vector.6
= control target key start
LH: loop header
LB: loop body
LE: loop exit
PB: predicated region body
PF: predicated region fallthrough
CT: control target
= control target key end

     0   :  { %s1645_s24 = smov 0   ;;  %s1794_s0 = inlined_call_operand.vmem [shape: f32[2,8,32], index: 0, kind: input, shape index: {}]   ;;  %s1795_s1 = inlined_call_operand.vmem [shape: f32[1,32], index: 1, kind: input, shape index: {}]   ;;  %s1796_s2 = inlined_call_operand.vmem [shape: f32[1,32], index: 2, kind: input, shape index: {}]   ;;  %s1797_s3 = inlined_call_operand.vmem [shape: f32[32,96], index: 3, kind: input, shape index: {}]   ;;  %s1798_s4 = inlined_call_operand.vmem [shape: f32[1,96], index: 4, kind: input, shape index: {}]   ;;  %s1799_s5 = inlined_call_operand.vmem [shape: f32[32,32], index: 5, kind: input, shape index: {}]   ;;  %s1800_s6 = inlined_call_operand.vmem [shape: f32[1,32], index: 6, kind: input, shape index: {}]   ;;  %s1801_s7 = inlined_call_operand.vmem [shape: f32[2,8,32], index: 7, kind: output, shape index: {}]  }
   0x1 LB: > { %s1415_s25 = sadd.s32 4294967295, %s1590_s24   ;;  %p1419_p0 = scmp.ge.s32.totalorder %s1590_s24, 1  ;;  %s1590_s24 = sphi %s1645_s24, %s17_s24  }
   0x2   : > { %p236_p1 = scmp.lt.s32.totalorder %s1590_s24, 3 }
   0x4   : > { %p237_p2 = pnand %p1419_p0, %p236_p1 }
   0x5   : > { %p266_p3 = scmp.lt.s32.totalorder (!%p237_p2), %s1415_s25, 1  ;;  %s1594_s21 = smov (!%p237_p2), 120  }
   0x6   : > { %240 = sbr.rel (%p237_p2) target bundleno = 2755 (0xac3), region = 48  ;;  %s1595_s22 = smov (!%p237_p2), 96  }
   0x7   : > { %s1596_s23 = smov (!%p237_p2), 88   ;;  %s1597_s27 = smov (!%p237_p2), 56  }
   0x8   : > { %s1598_s28 = smov (!%p237_p2), 64   ;;  %s1600_s30 = smov (!%p237_p2), 112  }
   0x9   : > { %s1601_s12 = smov (!%p237_p2), 48   ;;  %s1602_s13 = smov (!%p237_p2), 104  }
   0xa   : > { %s1603_s14 = smov (!%p237_p2), 72   ;;  %s1604_s17 = smov (!%p237_p2), 40  }
   0xb   : > { %s1803_s25 = smov (!%p266_p3, %s1415_s25), 1  ;;  %vm277_vm0 = vcmask 261120   ;;  %v309_v7 = vld [vmem:[%s1797_s3 + $0x18] sm:$0xff]  ;;  %v1592_v8 = vmov 0.0   ;;  %v308_v9 = vld [vmem:[%s1797_s3 + $0x10] sm:$0xff]  ;;  %vm1593_vm1 = vmmov 0  }
   0xc   : > { %s1420_s26 = sshll.u32 %s1803_s25, 3  ;;  %1474 = vmatprep.subr.mxu0 %v1592_v8  ;;  %1482 = vmatprep.mubr.msk.f32.mxu0 %vm1593_vm1, %v1592_v8  ;;  %v307_v10 = vld [vmem:[%s1797_s3 + $0x8] sm:$0xff]  ;;  %v306_v11 = vld [vmem:[%s1797_s3] sm:$0xff]  ;;  %vm393_vm2 = vcmask 64512  }
   0xd   : > { %s269_s29 = scalar_lea.vmem %s1794_s0, %s1420_s26  ;;  %1475 = vmatpush3.msra.mxu0 %v309_v7  ;;  %1485 = vmatprep.subr.mxu1 %v1592_v8  ;;  %v1422_v16 = vld [vmem:[%s1795_s1] ss:$0 sm:$0xff]  ;;  %v723_v55 = vld [vmem:[%s1799_s5 + $0x8] sm:$0xff] }
   0xe   : > { %v1661_v0 = vld [vmem:[%s269_s29] sm:$0xff]  ;;  %1476 = vmatprep.subr.mxu0 %v1592_v8  ;;  %1487 = vmatprep.mubr.msk.f32.mxu1 %vm1593_vm1, %v1592_v8  ;;  %s1599_s29 = smov 80  }
   0xf   : > { %v278_v1 = vsel %vm277_vm0, %v1661_v0, 0.0  ;;  %1477 = vmatpush3.msra.mxu0 %v308_v9  ;;  %v1423_v18 = vld [vmem:[%s1796_s2] ss:$0 sm:$0xff] }
  0x10   : > { %279 = vadd.xlane.f32.xlu0 %v278_v1  ;;  %1478 = vmatprep.subr.mxu0 %v1592_v8  ;;  %v1424_v21 = vld [vmem:[%s1798_s4] ss:$0 sm:$0xff] }
  0x11   : > { %1479 = vmatpush3.msra.mxu0 %v307_v10  ;;  %v556_v54 = vld [vmem:[%s1799_s5] sm:$0xff] }
  0x12   : > { %1480 = vmatprep.subr.mxu0 %v1592_v8 }
  0x13   : > { %1481 = vmatpush3.msra.mxu0 %v306_v11 }
  0x14   : > { %1495 = vmatprep.subr.mxu0 %v1592_v8 }
  0x99   : > { %v280_v2 = vpop.xlane.xlu0 %279 }
  0x9a   : > { %v282_v3 = vmul.f32 0.03125, %v280_v2 }
  0x9c   : > { %v283_v4 = vsub.f32 %v1661_v0, %v282_v3 }
  0x9e   : > { %v284_v5 = vmul.f32 %v283_v4, %v283_v4 }
  0xa0   : > { %v285_v6 = vsel %vm277_vm0, %v284_v5, 0.0 }
  0xa1   : > { %286 = vadd.xlane.f32.xlu0 %v285_v6 }
 0x12a   : > { %v287_v12 = vpop.xlane.xlu0 %286 }
 0x12b   : > { %v288_v13 = vmul.f32 0.03125, %v287_v12 }
 0x12d   : > { %v289_v14 = vadd.f32 1e-05, %v288_v13 }
 0x12f   : > { %1566 = vrsqrt.f32 %v289_v14 }
 0x13c   : > { %v1567_v15 = vpop.eup %1566 }
 0x13d   : > { %v291_v17 = vmul.f32 %v1567_v15, %v283_v4 }
 0x13f   : > { %v298_v19 = vmul.f32 %v1422_v16, %v291_v17 }
 0x141   : > { %v305_v20 = vadd.f32 %v1423_v18, %v298_v19 }
 0x143   : > { %1483 = vmatmul.mubr.msk.f32.vlgmr.msra.gmra.mxu0 %vm277_vm0, %v305_v20  ;;  %v1036_v20 = vld [vmem:[%s1799_s5 + $0x10] sm:$0xff] }
 0x144   : > { %1497 = vmatprep.mubr.msk.f32.mxu0 %vm1593_vm1, %v1592_v8 }
 0x203   : > { %v386_v22 = vpop.f32.mrf.mxu0 }
 0x204   : > { %v1701_v23 = vadd.f32 %v1424_v21, %v386_v22 }
 0x205   : > { %v1484_v24 = vpop.f32.mrf.mxu0 }
 0x206   : > { %557 = vrot.lane.b32.xlu0 %v1701_v23, %s1594_s21  ;;  %391 = vrot.lane.b32.xlu1 %v1701_v23, %s1595_s22 }
 0x20a   : > { %559 = vrot.lane.b32.xlu1 %v1701_v23, %s1596_s23 }
 0x278   : > { %v392_v25 = vpop.permute.xlu1 %391  ;;  %v558_v27 = vpop.permute.xlu0 %557 }
 0x279   : > { %1486 = vmatpush3.xpose.msk.msra.mxu1 %vm393_vm2, %v392_v25 }
 0x27a   : > { %1490 = vmatprep.subr.mxu1 %v1592_v8 }
 0x27c   : > { %1488 = vmatmul.mubr.msk.f32.vlgmr.msra.gmra.mxu1 %vm393_vm2, %v1701_v23  ;;  %v560_v26 = vpop.permute.xlu1 %559 }
 0x27d   : > { %1496 = vmatpush3.xpose.msk.msra.mxu0 %vm393_vm2, %v560_v26  ;;  %1492 = vmatprep.mubr.msk.f32.mxu1 %vm1593_vm1, %v1592_v8 }
 0x27e   : > { %1505 = vmatprep.subr.mxu0 %v1592_v8 }
 0x280   : > { %1498 = vmatmul.mubr.msk.f32.vlgmr.msra.gmra.mxu0 %vm393_vm2, %v558_v27 }
 0x281   : > { %1507 = vmatprep.mubr.msk.f32.mxu0 %vm1593_vm1, %v1592_v8  ;;  %1506 = vmatpush3.msra.mxu0 %v723_v55 }
 0x282   : > { %1515 = vmatprep.subr.mxu0 %v1592_v8 }
 0x33c   : > { %v464_v28 = vpop.f32.mrf.mxu1 }
 0x33d   : > { %v468_v29 = vmul.f32 0.35355338, %v464_v28 }
 0x33e   : > { %v1489_v30 = vpop.f32.mrf.mxu1 }
 0x33f   : > { %v469_v31 = vsel %vm393_vm2, %v468_v29, -inf }
 0x340   : > { %470 = vmax.xlane.f32.xlu1 %v469_v31  ;;  %v631_v32 = vpop.f32.mrf.mxu0 }
 0x341   : > { %v635_v33 = vmul.f32 0.35355338, %v631_v32 }
 0x342   : > { %v1499_v34 = vpop.f32.mrf.mxu0 }
 0x343   : > { %v636_v35 = vsel %vm393_vm2, %v635_v33, -inf }
 0x344   : > { %637 = vmax.xlane.f32.xlu0 %v636_v35 }
 0x35a   : > { %647 = vrot.lane.b32.xlu0 %v1701_v23, %s1597_s27  ;;  %s273_s27 = scalar_lea.vmem %s1801_s7, %s1420_s26 }
 0x3c9   : > { %v471_v36 = vpop.xlane.xlu1 %470 }
 0x3ca   : > { %v472_v37 = vsub.f32 %v468_v29, %v471_v36 }
 0x3cc   : > { %v473_v38 = vmul.f32 1.442695, %v472_v37 }
 0x3cd   : > { %v638_v39 = vpop.xlane.xlu0 %637 }
 0x3ce   : > { %1568 = vpow2.f32 %v473_v38  ;;  %v639_v40 = vsub.f32 %v635_v33, %v638_v39 }
 0x3d0   : > { %v640_v41 = vmul.f32 1.442695, %v639_v40 }
 0x3d1   : > { %v648_v51 = vpop.permute.xlu0 %647 }
 0x3d2   : > { %1570 = vpow2.f32 %v640_v41 }
 0x3db   : > { %v1569_v42 = vpop.eup %1568 }
 0x3dc   : > { %v475_v43 = vsel %vm393_vm2, %v1569_v42, 0.0 }
 0x3dd   : > { %476 = vadd.xlane.f32.xlu1 %v475_v43 }
 0x3df   : > { %v1571_v44 = vpop.eup %1570 }
 0x3e0   : > { %v642_v45 = vsel %vm393_vm2, %v1571_v44, 0.0 }
 0x3e1   : > { %643 = vadd.xlane.f32.xlu1 %v642_v45 }
 0x3f2   : > { %480 = vrot.lane.b32.xlu1 %v1701_v23, %s1598_s28 }
 0x3f6   : > { %872 = vrot.lane.b32.xlu1 %v1701_v23, %s1599_s29 }
 0x3fa   : > { %870 = vrot.lane.b32.xlu1 %v1701_v23, %s1600_s30 }
 0x466   : > { %v477_v46 = vpop.xlane.xlu1 %476 }
 0x467   : > { %1572 = vrcp.f32 %v477_v46 }
 0x46a   : > { %v644_v47 = vpop.xlane.xlu1 %643 }
 0x46b   : > { %1574 = vrcp.f32 %v644_v47 }
 0x46e   : > { %v481_v48 = vpop.permute.xlu1 %480 }
 0x46f   : > { %1491 = vmatpush3.msra.mxu1 %v481_v48 }
 0x470   : > { %1500 = vmatprep.subr.mxu1 %v1592_v8 }
 0x472   : > { %v873_v57 = vpop.permute.xlu1 %872 }
 0x474   : > { %v1573_v49 = vpop.eup %1572 }
 0x475   : > { %v479_v50 = vmul.f32 %v1573_v49, %v1569_v42  ;;  %v1442_v42 = vld [vmem:[%s1800_s6] ss:$0 sm:$0xff] }
 0x476   : > { %v871_v61 = vpop.permute.xlu1 %870 }
 0x477   : > { %1493 = vmatmul.mubr.msk.f32.vlgmr.msra.gmra.mxu1 %vm393_vm2, %v479_v50 }
 0x478   : > { %v1575_v52 = vpop.eup %1574  ;;  %1501 = vmatpush3.msra.mxu1 %v648_v51  ;;  %1502 = vmatprep.mubr.msk.f32.mxu1 %vm1593_vm1, %v1592_v8 }
 0x479   : > { %v646_v53 = vmul.f32 %v1575_v52, %v1571_v44  ;;  %1510 = vmatprep.subr.mxu1 %v1592_v8 }
 0x47b   : > { %1503 = vmatmul.mubr.msk.f32.vlgmr.msra.gmra.mxu1 %vm393_vm2, %v646_v53 }
 0x47c   : > { %1512 = vmatprep.mubr.msk.f32.mxu1 %vm1593_vm1, %v1592_v8  ;;  %1511 = vmatpush3.msra.mxu1 %v556_v54 }
 0x47d   : > { %1520 = vmatprep.subr.mxu1 %v1592_v8 }
 0x537   : > { %v552_v56 = vpop.f32.mrf.mxu1 }
 0x538   : > { %1513 = vmatmul.mubr.msk.f32.vlgmr.msra.gmra.mxu1 %vm393_vm2, %v552_v56 }
 0x539   : > { %v1494_v58 = vpop.f32.mrf.mxu1  ;;  %1522 = vmatprep.mubr.msk.f32.mxu1 %vm1593_vm1, %v1592_v8 }
 0x53b   : > { %v719_v59 = vpop.f32.mrf.mxu1 }
 0x53c   : > { %1508 = vmatmul.mubr.msk.f32.vlgmr.msra.gmra.mxu0 %vm393_vm2, %v719_v59 }
 0x53d   : > { %1516 = vmatpush3.xpose.msk.msra.mxu0 %vm393_vm2, %v873_v57  ;;  %v1504_v60 = vpop.f32.mrf.mxu1  ;;  %1517 = vmatprep.mubr.msk.f32.mxu0 %vm1593_vm1, %v1592_v8 }
 0x53e   : > { %1525 = vmatprep.subr.mxu0 %v1592_v8 }
 0x540   : > { %1518 = vmatmul.mubr.msk.f32.vlgmr.msra.gmra.mxu0 %vm393_vm2, %v871_v61 }
 0x541   : > { %1527 = vmatprep.mubr.msk.f32.mxu0 %vm1593_vm1, %v1592_v8  ;;  %1526 = vmatpush3.msra.mxu0 %v1036_v20 }
 0x542   : > { %1535 = vmatprep.subr.mxu0 %v1592_v8 }
 0x5f8   : > { %v866_v62 = vpop.f32.mrf.mxu1 }
 0x5fa   : > { %v1514_v63 = vpop.f32.mrf.mxu1 }
 0x5fc   : > { %v793_v1 = vpop.f32.mrf.mxu0 }
 0x5fd   : > { %v867_v2 = vadd.f32 %v866_v62, %v793_v1 }
 0x5fe   : > { %v1509_v3 = vpop.f32.mrf.mxu0 }
 0x600   : > { %v944_v4 = vpop.f32.mrf.mxu0 }
 0x601   : > { %v948_v5 = vmul.f32 0.35355338, %v944_v4 }
 0x602   : > { %v1519_v6 = vpop.f32.mrf.mxu0 }
 0x603   : > { %v949_v7 = vsel %vm393_vm2, %v948_v5, -inf }
 0x604   : > { %950 = vmax.xlane.f32.xlu1 %v949_v7 }
 0x615   : > { %960 = vrot.lane.b32.xlu1 %v1701_v23, %s1601_s12 }
 0x619   : > { %1111 = vrot.lane.b32.xlu1 %v1701_v23, %s1602_s13 }
 0x68d   : > { %v951_v9 = vpop.xlane.xlu1 %950 }
 0x68e   : > { %v952_v10 = vsub.f32 %v948_v5, %v951_v9 }
 0x690   : > { %v953_v11 = vmul.f32 1.442695, %v952_v10 }
 0x691   : > { %v961_v12 = vpop.permute.xlu1 %960 }
 0x692   : > { %1576 = vpow2.f32 %v953_v11  ;;  %1521 = vmatpush3.msra.mxu1 %v961_v12 }
 0x693   : > { %1530 = vmatprep.subr.mxu1 %v1592_v8 }
 0x695   : > { %v1112_v19 = vpop.permute.xlu1 %1111 }
 0x69f   : > { %v1577_v13 = vpop.eup %1576 }
 0x6a0   : > { %v955_v14 = vsel %vm393_vm2, %v1577_v13, 0.0 }
 0x6a1   : > { %956 = vadd.xlane.f32.xlu0 %v955_v14 }
 0x6b7   : > { %1113 = vrot.lane.b32.xlu0 %v1701_v23, %s1603_s14 }
 0x72a   : > { %v957_v15 = vpop.xlane.xlu0 %956 }
 0x72b   : > { %1578 = vrcp.f32 %v957_v15 }
 0x72e   : > { %v1114_v18 = vpop.permute.xlu0 %1113 }
 0x738   : > { %v1579_v16 = vpop.eup %1578 }
 0x739   : > { %v959_v17 = vmul.f32 %v1579_v16, %v1577_v13 }
 0x73b   : > { %1523 = vmatmul.mubr.msk.f32.vlgmr.msra.gmra.mxu1 %vm393_vm2, %v959_v17 }
 0x73c   : > { %1531 = vmatpush3.xpose.msk.msra.mxu1 %vm393_vm2, %v1114_v18  ;;  %1532 = vmatprep.mubr.msk.f32.mxu1 %vm1593_vm1, %v1592_v8 }
 0x73d   : > { %1540 = vmatprep.subr.mxu1 %v1592_v8 }
 0x73f   : > { %1533 = vmatmul.mubr.msk.f32.vlgmr.msra.gmra.mxu1 %vm393_vm2, %v1112_v19 }
 0x740   : > { %1542 = vmatprep.mubr.msk.f32.mxu1 %vm1593_vm1, %v1592_v8 }
 0x7fb   : > { %v1032_v21 = vpop.f32.mrf.mxu1 }
 0x7fc   : > { %1528 = vmatmul.mubr.msk.f32.vlgmr.msra.gmra.mxu0 %vm393_vm2, %v1032_v21 }
 0x7fd   : > { %v1524_v22 = vpop.f32.mrf.mxu1  ;;  %1537 = vmatprep.mubr.msk.f32.mxu0 %vm1593_vm1, %v1592_v8  ;;  %v1277_v8 = vld [vmem:[%s1799_s5 + $0x18] sm:$0xff] }
 0x7fe   : > { %1541 = vmatpush3.msra.mxu1 %v1277_v8 }
 0x7ff   : > { %v1185_v24 = vpop.f32.mrf.mxu1 }
 0x800   : > { %v1189_v25 = vmul.f32 0.35355338, %v1185_v24 }
 0x801   : > { %v1534_v26 = vpop.f32.mrf.mxu1 }
 0x802   : > { %v1190_v27 = vsel %vm393_vm2, %v1189_v25, -inf }
 0x803   : > { %1191 = vmax.xlane.f32.xlu1 %v1190_v27 }
 0x88c   : > { %v1192_v28 = vpop.xlane.xlu1 %1191 }
 0x88d   : > { %v1193_v29 = vsub.f32 %v1189_v25, %v1192_v28 }
 0x88f   : > { %v1194_v30 = vmul.f32 1.442695, %v1193_v29 }
 0x891   : > { %1580 = vpow2.f32 %v1194_v30 }
 0x89e   : > { %v1581_v31 = vpop.eup %1580 }
 0x89f   : > { %v1196_v32 = vsel %vm393_vm2, %v1581_v31, 0.0 }
 0x8a0   : > { %1197 = vadd.xlane.f32.xlu0 %v1196_v32 }
 0x8b6   : > { %1201 = vrot.lane.b32.xlu0 %v1701_v23, %s1604_s17 }
 0x8bc   : > { %v1106_v33 = vpop.f32.mrf.mxu0 }
 0x8bd   : > { %v1110_v34 = vadd.f32 %v1106_v33, %v867_v2 }
 0x8be   : > { %v1529_v35 = vpop.f32.mrf.mxu0 }
 0x929   : > { %v1198_v36 = vpop.xlane.xlu0 %1197 }
 0x92a   : > { %1582 = vrcp.f32 %v1198_v36 }
 0x92d   : > { %v1202_v37 = vpop.permute.xlu0 %1201 }
 0x92e   : > { %1536 = vmatpush3.msra.mxu0 %v1202_v37 }
 0x937   : > { %v1583_v38 = vpop.eup %1582 }
 0x938   : > { %v1200_v39 = vmul.f32 %v1583_v38, %v1581_v31 }
 0x93a   : > { %1538 = vmatmul.mubr.msk.f32.vlgmr.msra.gmra.mxu0 %vm393_vm2, %v1200_v39 }
 0x9fa   : > { %v1273_v40 = vpop.f32.mrf.mxu0 }
 0x9fb   : > { %1543 = vmatmul.mubr.msk.f32.vlgmr.msra.gmra.mxu1 %vm393_vm2, %v1273_v40 }
 0x9fc   : > { %v1539_v23 = vpop.f32.mrf.mxu0 }
 0xabb   : > { %v1347_v41 = vpop.f32.mrf.mxu1 }
 0xabc   : > { %v1351_v43 = vadd.f32 %v1347_v41, %v1110_v34 }
 0xabd   : > { %v1544_v44 = vpop.f32.mrf.mxu1 }
 0xabe   : > { %v1359_v45 = vadd.f32 %v1442_v42, %v1351_v43 }
 0xac0   : > { %v1360_v46 = vadd.f32 %v1359_v45, %v1661_v0 }
 0xac2   : > { %1361 = vst.msk [vmem:[%s273_s27] sm:$0xff] %vm277_vm0, %v1360_v46 }
 0xac3 PF: > { %s17_s24 = sadd.s32 1, %s1590_s24  }
 0xac4   : > { %p14_p4 = scmp.ge.s32.totalorder %s17_s24, 4  }
 0xac6   :  { %16 = sbr.rel (!%p14_p4) target bundleno = 1 (0x1), region = 78 }

// kernel: sequence_to_vector.5
= control target key start
LH: loop header
LB: loop body
LE: loop exit
PB: predicated region body
PF: predicated region fallthrough
CT: control target
= control target key end

     0   :  { %s2096_s27 = smov 0   ;;  %s2735_s0 = inlined_call_operand.vmem [shape: f32[2,8,32], index: 0, kind: input, shape index: {}]   ;;  %s2736_s1 = inlined_call_operand.vmem [shape: f32[1,32], index: 1, kind: input, shape index: {}]   ;;  %s2737_s2 = inlined_call_operand.vmem [shape: f32[1,32], index: 2, kind: input, shape index: {}]   ;;  %s2738_s3 = inlined_call_operand.vmem [shape: f32[32,128], index: 3, kind: input, shape index: {}]   ;;  %s2739_s4 = inlined_call_operand.vmem [shape: f32[1,128], index: 4, kind: input, shape index: {}]   ;;  %s2740_s5 = inlined_call_operand.vmem [shape: f32[3,128], index: 5, kind: input, shape index: {}]   ;;  %s2741_s6 = inlined_call_operand.vmem [shape: f32[1,128], index: 6, kind: input, shape index: {}]   ;;  %s2742_s7 = inlined_call_operand.vmem [shape: f32[128,16], index: 7, kind: input, shape index: {}]   ;;  %s2743_s8 = inlined_call_operand.vmem [shape: f32[1,16], index: 8, kind: input, shape index: {}]   ;;  %s2744_s9 = inlined_call_operand.vmem [shape: f32[32,128], index: 9, kind: input, shape index: {}]   ;;  %s2745_s10 = inlined_call_operand.vmem [shape: f32[32,1], index: 10, kind: input, shape index: {}]   ;;  %s2746_s11 = inlined_call_operand.vmem [shape: f32[16,128], index: 11, kind: input, shape index: {}]   ;;  %s2747_s12 = inlined_call_operand.vmem [shape: f32[1,128], index: 12, kind: input, shape index: {}]   ;;  %s2748_s13 = inlined_call_operand.vmem [shape: f32[32,128], index: 13, kind: input, shape index: {}]   ;;  %s2749_s14 = inlined_call_operand.vmem [shape: f32[32,128], index: 14, kind: input, shape index: {}]   ;;  %s2750_s15 = inlined_call_operand.vmem [shape: f32[1,128], index: 15, kind: input, shape index: {}]   ;;  %s2751_s16 = inlined_call_operand.vmem [shape: f32[128,32], index: 16, kind: input, shape index: {}]   ;;  %s2752_s17 = inlined_call_operand.vmem [shape: f32[1,32], index: 17, kind: input, shape index: {}]   ;;  %s2753_s18 = inlined_call_operand.vmem [shape: f32[2,8,32], index: 18, kind: output, shape index: {}]  }
   0x1   :  { %2754 = sst [smem:[#allocation3_spill]] %s2735_s0 }
   0x2   :  { %2755 = sst [smem:[#allocation4_spill]] %s2736_s1 }
   0x3   :  { %2756 = sst [smem:[#allocation5_spill]] %s2737_s2 }
   0x4 LB: > { %s1699_s28 = sadd.s32 4294967295, %s1989_s27   ;;  %p1703_p0 = scmp.ge.s32.totalorder %s1989_s27, 1  ;;  %s1989_s27 = sphi %s2096_s27, %s28_s27  }
   0x5   : > { %p511_p1 = scmp.lt.s32.totalorder %s1989_s27, 3 }
   0x7   : > { %p512_p2 = pnand %p1703_p0, %p511_p1 }
   0x8   : > { %p563_p3 = scmp.lt.s32.totalorder (!%p512_p2), %s1699_s28, 1  ;;  %s2757_s19 = sld [smem:[#allocation3_spill]] (!%p512_p2) }
   0x9   : > { %515 = sbr.rel (%p512_p2) target bundleno = 1428 (0x594), region = 92  ;;  %s2759_s21 = sld [smem:[#allocation5_spill]] (!%p512_p2) }
   0xe   : > { %s2761_s28 = smov (!%p563_p3, %s1699_s28), 1  ;;  %vm574_vm0 = vcmask 261120   ;;  %v606_v7 = vld [vmem:[%s2738_s3 + $0x18] sm:$0xff]  ;;  %v1991_v8 = vmov 0.0   ;;  %v605_v9 = vld [vmem:[%s2738_s3 + $0x10] sm:$0xff]  ;;  %vm1992_vm1 = vmmov 0   ;;  %v687_v39 = vlaneseq }
   0xf   : > { %s1704_s29 = sshll.u32 %s2761_s28, 3  ;;  %1765 = vmatprep.subr.mxu1 %v1991_v8  ;;  %1773 = vmatprep.mubr.msk.f32.mxu1 %vm1992_vm1, %v1991_v8  ;;  %v604_v10 = vld [vmem:[%s2738_s3 + $0x8] sm:$0xff]  ;;  %v603_v11 = vld [vmem:[%s2738_s3] sm:$0xff]  ;;  %v743_v21 = vld [vmem:[%s2742_s7 + $0x78] sm:$0xff]  ;;  %vm830_vm4 = vcmask 130048  }
  0x10   : > { %s566_s1 = scalar_lea.vmem %s2757_s19, %s1704_s29  ;;  %1766 = vmatpush3.msra.mxu1 %v606_v7  ;;  %1811 = vmatprep.subr.mxu0 %v1991_v8  ;;  %s2758_s19 = sld [smem:[#allocation4_spill]]  ;;  %v1707_v18 = vld [vmem:[%s2759_s21] ss:$0 sm:$0xff]  ;;  %v742_v22 = vld [vmem:[%s2742_s7 + $0x70] sm:$0xff]  ;;  %v741_v23 = vld [vmem:[%s2742_s7 + $0x68] sm:$0xff]  ;;  %v2215_v40 = vshrl.u32 %v687_v39, 7 }
  0x11   : > { %v571_v0 = vld [vmem:[%s566_s1] sm:$0xff]  ;;  %1767 = vmatprep.subr.mxu1 %v1991_v8  ;;  %1815 = vmatprep.mubr.msk.f32.mxu0 %vm1992_vm1, %v1991_v8  ;;  %v739_v25 = vld [vmem:[%s2742_s7 + $0x58] sm:$0xff]  ;;  %v738_v26 = vld [vmem:[%s2742_s7 + $0x50] sm:$0xff] }
  0x12   : > { %v575_v1 = vsel %vm574_vm0, %v571_v0, 0.0  ;;  %1768 = vmatpush3.msra.mxu1 %v605_v9  ;;  %v740_v24 = vld [vmem:[%s2742_s7 + $0x60] sm:$0xff]  ;;  %v737_v27 = vld [vmem:[%s2742_s7 + $0x48] sm:$0xff]  ;;  %v735_v29 = vld [vmem:[%s2742_s7 + $0x38] sm:$0xff]  ;;  %v2221_v42 = vsub.s32 0, %v2215_v40  ;;  %v2224_v43 = vsub.s32 1, %v2215_v40 }
  0x13   : > { %576 = vadd.xlane.f32.xlu0 %v575_v1  ;;  %1769 = vmatprep.subr.mxu1 %v1991_v8  ;;  %v736_v28 = vld [vmem:[%s2742_s7 + $0x40] sm:$0xff]  ;;  %v734_v30 = vld [vmem:[%s2742_s7 + $0x30] sm:$0xff]  ;;  %v733_v31 = vld [vmem:[%s2742_s7 + $0x28] sm:$0xff]  ;;  %v2230_v46 = vsub.s32 2, %v2215_v40  ;;  %vm689_vm2 = vcmp.eq.s32.totalorder %v2215_v40, 0  ;;  %vm692_vm3 = vcmp.eq.s32.totalorder %v2215_v40, 7 }
  0x14   : > { %1770 = vmatpush3.msra.mxu1 %v604_v10  ;;  %v822_v32 = vld [vmem:[%s2746_s11 + $0x8] sm:$0xff]  ;;  %v821_v33 = vld [vmem:[%s2746_s11] sm:$0xff]  ;;  %v731_v35 = vld [vmem:[%s2742_s7 + $0x18] sm:$0xff] }
  0x15   : > { %1771 = vmatprep.subr.mxu1 %v1991_v8  ;;  %1812 = vmatpush3.msra.mxu0 %v822_v32  ;;  %v732_v34 = vld [vmem:[%s2742_s7 + $0x20] sm:$0xff]  ;;  %v730_v36 = vld [vmem:[%s2742_s7 + $0x10] sm:$0xff]  ;;  %v729_v37 = vld [vmem:[%s2742_s7 + $0x8] sm:$0xff]  ;;  %v1998_v32 = vmov 2  }
  0x16   : > { %1772 = vmatpush3.msra.mxu1 %v603_v11  ;;  %v1706_v16 = vld [vmem:[%s2758_s19] ss:$0 sm:$0xff]  ;;  %1813 = vmatprep.subr.mxu0 %v1991_v8  ;;  %v925_v7 = vld [vmem:[%s2745_s10 + $0x10] sm:$0xff]  ;;  %v924_v9 = vld [vmem:[%s2745_s10 + $0x8] sm:$0xff]  ;;  %s570_s19 = scalar_lea.vmem %s2753_s18, %s1704_s29 }
  0x17   : > { %1776 = vmatprep.subr.mxu1 %v1991_v8  ;;  %1814 = vmatpush3.msra.mxu0 %v821_v33  ;;  %v728_v38 = vld [vmem:[%s2742_s7] sm:$0xff]  ;;  %v926_v10 = vld [vmem:[%s2745_s10 + $0x18] sm:$0xff] }
  0x18   : > { %v1708_v41 = vld [vmem:[%s2739_s4] ss:$0 sm:$0xff] }
  0x19   : > { %v695_v44 = vld [vmem:[%s2740_s5] sm:$0x7] }
  0x1a   : > { %v699_v48 = vrot.slane %v695_v44, %v2221_v42  ;;  %v704_v49 = vrot.slane %v695_v44, %v2224_v43  ;;  %v710_v53 = vrot.slane %v695_v44, %v2230_v46  ;;  %v1710_v60 = vld [vmem:[%s2741_s6] ss:$0 sm:$0xff] }
  0x1b   : > { %v1711_v11 = vld [vmem:[%s2743_s8] ss:$0 sm:$0xff] }
  0x1c   : > { %v1712_v39 = vld [vmem:[%s2747_s12] ss:$0 sm:$0xff] }
  0x9c   : > { %v577_v2 = vpop.xlane.xlu0 %576 }
  0x9d   : > { %v579_v3 = vmul.f32 0.03125, %v577_v2 }
  0x9f   : > { %v580_v4 = vsub.f32 %v571_v0, %v579_v3 }
  0xa1   : > { %v581_v5 = vmul.f32 %v580_v4, %v580_v4 }
  0xa3   : > { %v582_v6 = vsel %vm574_vm0, %v581_v5, 0.0  ;;  %v923_v5 = vld [vmem:[%s2745_s10] sm:$0xff] }
  0xa4   : > { %583 = vadd.xlane.f32.xlu0 %v582_v6  ;;  %v1993_v6 = vmov 0  }
  0xa5   : > { %1879 = vset.pattern.permute.xlu1 %v1993_v6  ;;  %1880 = vset.pattern.permute.xlu0 %v1993_v6 }
  0xa6   : > { %929 = vperm.xlu1 %1879, %v923_v5  }
  0xaa   : > { %934 = vperm.xlu1 %1879, %v924_v9  }
  0xae   : > { %944 = vperm.xlu1 %1879, %v926_v10   ;;  %v1123_v10 = vsub.s32 5, %v2215_v40 }
  0xba   : > { %939 = vperm.xlu0 %1880, %v925_v7   ;;  %v1107_v7 = vsub.s32 4, %v2215_v40 }
 0x12d   : > { %v584_v12 = vpop.xlane.xlu0 %583 }
 0x12e   : > { %v585_v13 = vmul.f32 0.03125, %v584_v12 }
 0x130   : > { %v586_v14 = vadd.f32 1e-05, %v585_v13 }
 0x132   : > { %1909 = vrsqrt.f32 %v586_v14  ;;  %v919_v14 = vld [vmem:[%s2744_s9] sm:$0xff] }
 0x13f   : > { %v1910_v15 = vpop.eup %1909 }
 0x140   : > { %v588_v17 = vmul.f32 %v1910_v15, %v580_v4 }
 0x142   : > { %v595_v19 = vmul.f32 %v1706_v16, %v588_v17  ;;  %v920_v16 = vld [vmem:[%s2744_s9 + $0x8] sm:$0xff]  ;;  %v921_v17 = vld [vmem:[%s2744_s9 + $0x10] sm:$0xff] }
 0x144   : > { %v602_v20 = vadd.f32 %v1707_v18, %v595_v19  ;;  %v922_v18 = vld [vmem:[%s2744_s9 + $0x18] sm:$0xff]  ;;  %v1994_v19 = vmov 3  }
 0x145   : > { %1883 = vset.pattern.permute.xlu0 %v1994_v19 }
 0x146   : > { %1774 = vmatmul.mubr.msk.f32.vlgmr.msra.gmra.mxu1 %vm574_vm0, %v602_v20  ;;  %v930_v20 = vpop.permute.xlu1 %929 }
 0x147   : > { %1808 = vmatprep.mubr.msk.f32.mxu1 %vm1992_vm1, %v1991_v8  ;;  %1777 = vmatpush3.msra.mxu1 %v743_v21 }
 0x148   : > { %1778 = vmatprep.subr.mxu1 %v1991_v8 }
 0x149   : > { %1779 = vmatpush3.msra.mxu1 %v742_v22 }
 0x14a   : > { %1780 = vmatprep.subr.mxu1 %v1991_v8 }
 0x14b   : > { %1781 = vmatpush3.msra.mxu1 %v741_v23  ;;  %v935_v23 = vpop.permute.xlu1 %934 }
 0x14c   : > { %1782 = vmatprep.subr.mxu1 %v1991_v8 }
 0x14d   : > { %1783 = vmatpush3.msra.mxu1 %v740_v24 }
 0x14e   : > { %1784 = vmatprep.subr.mxu1 %v1991_v8 }
 0x14f   : > { %1785 = vmatpush3.msra.mxu1 %v739_v25  ;;  %v945_v33 = vpop.permute.xlu1 %944 }
 0x150   : > { %1786 = vmatprep.subr.mxu1 %v1991_v8 }
 0x151   : > { %1787 = vmatpush3.msra.mxu1 %v738_v26  ;;  %v1995_v26 = vmov 5  }
 0x152   : > { %1788 = vmatprep.subr.mxu1 %v1991_v8 }
 0x153   : > { %1789 = vmatpush3.msra.mxu1 %v737_v27  ;;  %v1996_v27 = vmov 1  }
 0x154   : > { %1790 = vmatprep.subr.mxu1 %v1991_v8 }
 0x155   : > { %1791 = vmatpush3.msra.mxu1 %v736_v28 }
 0x156   : > { %1792 = vmatprep.subr.mxu1 %v1991_v8 }
 0x157   : > { %1793 = vmatpush3.msra.mxu1 %v735_v29 }
 0x158   : > { %1794 = vmatprep.subr.mxu1 %v1991_v8 }
 0x159   : > { %1795 = vmatpush3.msra.mxu1 %v734_v30 }
 0x15a   : > { %1796 = vmatprep.subr.mxu1 %v1991_v8 }
 0x15b   : > { %1797 = vmatpush3.msra.mxu1 %v733_v31  ;;  %v1997_v31 = vmov 4  }
 0x15c   : > { %1798 = vmatprep.subr.mxu1 %v1991_v8 }
 0x15d   : > { %1799 = vmatpush3.msra.mxu1 %v732_v34 }
 0x15e   : > { %1800 = vmatprep.subr.mxu1 %v1991_v8 }
 0x15f   : > { %1801 = vmatpush3.msra.mxu1 %v731_v35 }
 0x160   : > { %1802 = vmatprep.subr.mxu1 %v1991_v8 }
 0x161   : > { %1803 = vmatpush3.msra.mxu1 %v730_v36  ;;  %v940_v36 = vpop.permute.xlu0 %939 }
 0x162   : > { %1804 = vmatprep.subr.mxu1 %v1991_v8 }
 0x163   : > { %1805 = vmatpush3.msra.mxu1 %v729_v37 }
 0x164   : > { %1806 = vmatprep.subr.mxu1 %v1991_v8 }
 0x165   : > { %1807 = vmatpush3.msra.mxu1 %v728_v38  ;;  %v1999_v38 = vmov 6  }
 0x206   : > { %v683_v45 = vpop.f32.mrf.mxu1 }
 0x207   : > { %v684_v47 = vadd.f32 %v1708_v41, %v683_v45  ;;  %v2000_v41 = vmov 7  }
 0x208   : > { %v1775_v50 = vpop.f32.mrf.mxu1 }
 0x209   : > { %v690_v51 = vrot.slane %v684_v47, 7  ;;  %v693_v52 = vrot.slane %v684_v47, 1  ;;  %v705_v57 = vmul.f32 %v704_v49, %v684_v47 }
 0x20b   : > { %v691_v54 = vsel %vm689_vm2, 0.0, %v690_v51  ;;  %v694_v55 = vsel %vm692_vm3, 0.0, %v693_v52 }
 0x20c   : > { %v700_v56 = vmul.f32 %v699_v48, %v691_v54  ;;  %v711_v59 = vmul.f32 %v710_v53, %v694_v55 }
 0x20e   : > { %v706_v58 = vadd.f32 %v705_v57, %v700_v56 }
 0x210   : > { %v712_v61 = vadd.f32 %v711_v59, %v706_v58 }
 0x212   : > { %v720_v62 = vadd.f32 %v1710_v60, %v712_v61  ;;  %v2339_v61 = vld [vmem:[%s2748_s13 + $0x8] sm:$0xff] }
 0x214   : > { %v721_v63 = vsub.f32 0.0, %v720_v62 }
 0x216   : > { %v722_v0 = vmul.f32 1.442695, %v721_v63 }
 0x218   : > { %1911 = vpow2.f32 %v722_v0 }
 0x225   : > { %v1912_v1 = vpop.eup %1911 }
 0x226   : > { %v724_v2 = vadd.f32 1.0, %v1912_v1 }
 0x228   : > { %1913 = vrcp.f32 %v724_v2 }
 0x235   : > { %v1914_v3 = vpop.eup %1913 }
 0x236   : > { %v2240_v4 = vmul.f32 %v1914_v3, %v720_v62  ;;  %v1091_v3 = vsub.s32 3, %v2215_v40 }
 0x238   : > { %1809 = vmatmul.mubr.f32.vlgmr.msra.gmra.mxu1 %v2240_v4  ;;  %1818 = vmatprep.subr.mxu0 %v2240_v4 }
 0x2f8   : > { %v817_v12 = vpop.f32.mrf.mxu1 }
 0x2f9   : > { %v818_v13 = vadd.f32 %v1711_v11, %v817_v12 }
 0x2fa   : > { %v1810_v15 = vpop.f32.mrf.mxu1 }
 0x2fb   : > { %1816 = vmatmul.mubr.msk.f32.vlgmr.msra.gmra.mxu0 %vm830_vm4, %v818_v13  ;;  %v2379_v15 = vld [vmem:[%s2748_s13] sm:$0xff] }
 0x2fc   : > { %1819 = vmatpush3.xpose.msra.mxu0 %v2240_v4  ;;  %1820 = vmatprep.mubr.f32.mxu0 %v919_v14 }
 0x2fd   : > { %1826 = vmatprep.subr.mxu0 %v1991_v8 }
 0x2ff   : > { %1821 = vmatmul.mubr.f32.vlgmr.msra.gmra.mxu0 %v920_v16 }
 0x300   : > { %1823 = vmatprep.mubr.f32.mxu0 %v921_v17 }
 0x303   : > { %1824 = vmatmul.mubr.f32.gmra.mxu0 %v922_v18  ;;  %v1139_v18 = vsub.s32 6, %v2215_v40 }
 0x304   : > { %1858 = vmatprep.mubr.msk.f32.mxu0 %vm1992_vm1, %v1991_v8 }
 0x3bb   : > { %v900_v21 = vpop.f32.mrf.mxu0 }
 0x3bc   : > { %v901_v44 = vadd.f32 %v1712_v39, %v900_v21 }
 0x3bd   : > { %v1817_v22 = vpop.f32.mrf.mxu0 }
 0x3be   : > { %v905_v45 = vand.u32 2147483647, %v901_v44  ;;  %v904_v58 = vmax.f32 %v901_v44, 0.0  ;;  %v1564_v44 = vld [vmem:[%s2751_s16 + $0x68] sm:$0xff] }
 0x3bf   : > { %v1822_v24 = vpop.f32.mrf.mxu0 }
 0x3c0   : > { %v2278_v25 = vadd.f32 %v1822_v24, %v935_v23  ;;  %v906_v47 = vsub.f32 0.0, %v905_v45  ;;  %v2398_v23 = vld [vmem:[%s2749_s14 + $0x8] sm:$0xff] }
 0x3c1   : > { %v1013_v28 = vpop.f32.mrf.mxu0 }
 0x3c2   : > { %1266 = vperm.xlu0 %1883, %v2278_v25   ;;  %1180 = vperm.xlu1 %1879, %v2278_v25   ;;  %v2285_v29 = vadd.f32 %v1013_v28, %v930_v20  ;;  %v907_v48 = vmul.f32 1.442695, %v906_v47 }
 0x3c3   : > { %v1825_v30 = vpop.f32.mrf.mxu0 }
 0x3c4   : > { %v2290_v34 = vadd.f32 %v1825_v30, %v945_v33  ;;  %1915 = vpow2.f32 %v907_v48 }
 0x3c5   : > { %v1023_v35 = vpop.f32.mrf.mxu0 }
 0x3c6   : > { %1885 = vset.pattern.permute.xlu0 %v1995_v26  ;;  %1881 = vset.pattern.permute.xlu1 %v1996_v27  ;;  %v2295_v37 = vadd.f32 %v1023_v35, %v940_v36 }
 0x3c7   : > { %1322 = vperm.xlu0 %1885, %v2278_v25   ;;  %1210 = vperm.xlu1 %1881, %v2278_v25  }
 0x3cb   : > { %1890 = vset.pattern.permute.xlu0 %v1997_v31  ;;  %1882 = vset.pattern.permute.xlu1 %v1998_v32 }
 0x3cc   : > { %1238 = vperm.xlu1 %1882, %v2278_v25   ;;  %1290 = vperm.xlu0 %1890, %v2285_v29  }
 0x3d0   : > { %1884 = vset.pattern.permute.xlu1 %v1997_v31  ;;  %1302 = vperm.xlu0 %1890, %v2290_v34  }
 0x3d1   : > { %1294 = vperm.xlu1 %1884, %v2278_v25   ;;  %v1916_v49 = vpop.eup %1915 }
 0x3d2   : > { %v909_v50 = vadd.f32 1.0, %v1916_v49  ;;  %v912_v51 = vmul.f32 -0.5, %v1916_v49  ;;  %v915_v54 = vand.u32 2147483647, %v1916_v49 }
 0x3d4   : > { %1899 = vset.pattern.permute.xlu0 %v1998_v32  ;;  %1917 = vlog2.f32 %v909_v50  ;;  %v913_v53 = vadd.f32 1.0, %v912_v51  ;;  %vm916_vm5 = vcmp.lt.f32.partialorder %v915_v54, 0.0004427343 }
 0x3d5   : > { %1886 = vset.pattern.permute.xlu1 %v1993_v6  ;;  %1242 = vperm.xlu0 %1899, %v2295_v37  }
 0x3d6   : > { %1175 = vperm.xlu1 %1886, %v2285_v29   ;;  %v914_v56 = vmul.f32 %v1916_v49, %v913_v53  ;;  %v1563_v49 = vld [vmem:[%s2751_s16 + $0x60] sm:$0xff] }
 0x3d9   : > { %1900 = vset.pattern.permute.xlu0 %v1999_v38 }
 0x3da   : > { %1887 = vset.pattern.permute.xlu1 %v1996_v27  ;;  %1346 = vperm.xlu0 %1900, %v2285_v29  }
 0x3db   : > { %1206 = vperm.xlu1 %1887, %v2285_v29  }
 0x3de   : > { %1358 = vperm.xlu0 %1900, %v2290_v34  }
 0x3df   : > { %1888 = vset.pattern.permute.xlu1 %v1998_v32 }
 0x3e0   : > { %1234 = vperm.xlu1 %1888, %v2285_v29  }
 0x3e1   : > { %v1918_v52 = vpop.eup %1917 }
 0x3e2   : > { %1907 = vset.pattern.permute.xlu0 %v2000_v41  ;;  %v911_v55 = vmul.f32 0.6931472, %v1918_v52 }
 0x3e3   : > { %1378 = vperm.xlu0 %1907, %v2278_v25  }
 0x3e4   : > { %1889 = vset.pattern.permute.xlu1 %v1994_v19  ;;  %v917_v57 = vsel %vm916_vm5, %v914_v56, %v911_v55 }
 0x3e5   : > { %1262 = vperm.xlu1 %1889, %v2285_v29   ;;  %v2327_v59 = vadd.f32 %v917_v57, %v904_v58  ;;  %v1562_v57 = vld [vmem:[%s2751_s16 + $0x58] sm:$0xff] }
 0x3e7   : > { %v2333_v60 = vrot.slane %v2327_v59, %v2221_v42  ;;  %v2346_v63 = vrot.slane %v2327_v59, %v2224_v43  ;;  %v2353_v2 = vrot.slane %v2327_v59, %v2230_v46  ;;  %v2362_v9 = vrot.slane %v2327_v59, %v1091_v3 }
 0x3e8   : > { %v2368_v12 = vrot.slane %v2327_v59, %v1107_v7  ;;  %v2372_v13 = vmul.f32 %v2327_v59, %v2240_v4  ;;  %v2384_v16 = vrot.slane %v2327_v59, %v1123_v10  ;;  %v2409_v28 = vrot.slane %v2327_v59, %v1139_v18 }
 0x3e9   : > { %1891 = vset.pattern.permute.xlu1 %v1995_v26  ;;  %v1046_v62 = vmul.f32 %v2333_v60, %v2339_v61  ;;  %v1062_v1 = vmul.f32 %v2346_v63, %v2339_v61  ;;  %v1094_v14 = vmul.f32 %v2362_v9, %v2339_v61  ;;  %v1045_v21 = vmul.f32 %v2333_v60, %v2379_v15 }
 0x3ea   : > { %1318 = vperm.xlu1 %1891, %v2285_v29   ;;  %v1110_v17 = vmul.f32 %v2368_v12, %v2339_v61  ;;  %v1061_v35 = vmul.f32 %v2346_v63, %v2379_v15  ;;  %v2434_v47 = vrot.slane %v2372_v13, %v2230_v46  ;;  %v1077_v53 = vmul.f32 %v2353_v2, %v2379_v15 }
 0x3eb   : > { %v1051_v0 = vmul.f32 1.442695, %v1046_v62  ;;  %v1067_v5 = vmul.f32 1.442695, %v1062_v1  ;;  %v1099_v20 = vmul.f32 1.442695, %v1094_v14  ;;  %v2445_v55 = vrot.slane %v2372_v13, %v1091_v3 }
 0x3ec   : > { %v1065_v48 = vmul.f32 1.442695, %v1061_v35  ;;  %v1561_v1 = vld [vmem:[%s2751_s16 + $0x50] sm:$0xff]  ;;  %v2462_v3 = vrot.slane %v2372_v13, %v1107_v7 }
 0x3ed   : > { %1919 = vpow2.f32 %v1051_v0 }
 0x3ee   : > { %1892 = vset.pattern.permute.xlu1 %v1993_v6  ;;  %1921 = vpow2.f32 %v1067_v5  ;;  %v1081_v5 = vmul.f32 1.442695, %v1077_v53 }
 0x3ef   : > { %1190 = vperm.xlu1 %1892, %v2290_v34  }
 0x3f3   : > { %1893 = vset.pattern.permute.xlu1 %v1996_v27 }
 0x3f4   : > { %1218 = vperm.xlu1 %1893, %v2290_v34  }
 0x3f8   : > { %1894 = vset.pattern.permute.xlu1 %v1998_v32  ;;  %v2415_v32 = vrot.slane %v2372_v13, %v2224_v43  ;;  %v1565_v43 = vld [vmem:[%s2751_s16 + $0x70] sm:$0xff] }
 0x3f9   : > { %1246 = vperm.xlu1 %1894, %v2290_v34  }
 0x3fa   : > { %v1920_v22 = vpop.eup %1919 }
 0x3fb   : > { %v1922_v36 = vpop.eup %1921 }
 0x3fd   : > { %1895 = vset.pattern.permute.xlu1 %v1994_v19 }
 0x3fe   : > { %1274 = vperm.xlu1 %1895, %v2290_v34  }
 0x402   : > { %1896 = vset.pattern.permute.xlu1 %v1995_v26 }
 0x403   : > { %1330 = vperm.xlu1 %1896, %v2290_v34  }
 0x407   : > { %1897 = vset.pattern.permute.xlu1 %v1993_v6  ;;  %v1078_v6 = vmul.f32 %v2353_v2, %v2339_v61 }
 0x408   : > { %1185 = vperm.xlu1 %1897, %v2295_v37  }
 0x409   : > { %v1083_v11 = vmul.f32 1.442695, %v1078_v6  ;;  %v1093_v6 = vmul.f32 %v2362_v9, %v2379_v15 }
 0x40b   : > { %1923 = vpow2.f32 %v1083_v11 }
 0x40c   : > { %1898 = vset.pattern.permute.xlu1 %v1996_v27  ;;  %v1115_v27 = vmul.f32 1.442695, %v1110_v17  ;;  %1925 = vpow2.f32 %v1099_v20  ;;  %v1560_v17 = vld [vmem:[%s2751_s16 + $0x48] sm:$0xff] }
 0x40d   : > { %1214 = vperm.xlu1 %1898, %v2295_v37  }
 0x40e   : > { %1927 = vpow2.f32 %v1115_v27 }
 0x411   : > { %1901 = vset.pattern.permute.xlu1 %v1999_v38 }
 0x412   : > { %1350 = vperm.xlu1 %1901, %v2278_v25   ;;  %v1566_v25 = vld [vmem:[%s2751_s16 + $0x78] sm:$0xff] }
 0x413   : > { %1827 = vmatpush3.msra.mxu0 %v1566_v25 }
 0x414   : > { %1828 = vmatprep.subr.mxu0 %v1991_v8 }
 0x415   : > { %1829 = vmatpush3.msra.mxu0 %v1565_v43 }
 0x416   : > { %1902 = vset.pattern.permute.xlu1 %v2000_v41  ;;  %1830 = vmatprep.subr.mxu0 %v1991_v8 }
 0x417   : > { %1374 = vperm.xlu1 %1902, %v2285_v29   ;;  %v1398_v29 = vmul.f32 0.0, %v1920_v22  ;;  %1831 = vmatpush3.msra.mxu0 %v1564_v44 }
 0x418   : > { %v1924_v54 = vpop.eup %1923  ;;  %1832 = vmatprep.subr.mxu0 %v1991_v8 }
 0x419   : > { %1833 = vmatpush3.msra.mxu0 %v1563_v49  ;;  %v1926_v20 = vpop.eup %1925 }
 0x41a   : > { %1834 = vmatprep.subr.mxu0 %v1991_v8 }
 0x41b   : > { %1903 = vset.pattern.permute.xlu1 %v1994_v19  ;;  %v2391_v19 = vrot.slane %v2372_v13, %v2221_v42  ;;  %v1126_v42 = vmul.f32 %v2384_v16, %v2339_v61  ;;  %1835 = vmatpush3.msra.mxu0 %v1562_v57  ;;  %v1555_v57 = vld [vmem:[%s2751_s16 + $0x20] sm:$0xff] }
 0x41c   : > { %1270 = vperm.xlu1 %1903, %v2295_v37   ;;  %1836 = vmatprep.subr.mxu0 %v1991_v8 }
 0x41d   : > { %v1131_v39 = vmul.f32 1.442695, %v1126_v42  ;;  %1837 = vmatpush3.msra.mxu0 %v1561_v1  ;;  %v2482_v42 = vrot.slane %v2372_v13, %v1123_v10 }
 0x41e   : > { %1838 = vmatprep.subr.mxu0 %v1991_v8 }
 0x41f   : > { %1839 = vmatpush3.msra.mxu0 %v1560_v17 }
 0x420   : > { %1904 = vset.pattern.permute.xlu1 %v1997_v31  ;;  %v1049_v31 = vmul.f32 1.442695, %v1045_v21  ;;  %1840 = vmatprep.subr.mxu0 %v1991_v8 }
 0x421   : > { %1298 = vperm.xlu1 %1904, %v2295_v37  }
 0x422   : > { %1929 = vpow2.f32 %v1049_v31 }
 0x423   : > { %1931 = vpow2.f32 %v1131_v39  ;;  %v1557_v39 = vld [vmem:[%s2751_s16 + $0x30] sm:$0xff] }
 0x424   : > { %1933 = vpow2.f32 %v1065_v48  ;;  %v1556_v48 = vld [vmem:[%s2751_s16 + $0x28] sm:$0xff] }
 0x425   : > { %1905 = vset.pattern.permute.xlu1 %v1995_v26 }
 0x426   : > { %1326 = vperm.xlu1 %1905, %v2295_v37  }
 0x42a   : > { %1906 = vset.pattern.permute.xlu1 %v1999_v38 }
 0x42b   : > { %1354 = vperm.xlu1 %1906, %v2295_v37  }
 0x42f   : > { %1908 = vset.pattern.permute.xlu1 %v2000_v41  ;;  %v1142_v41 = vmul.f32 %v2409_v28, %v2339_v61 }
 0x430   : > { %1382 = vperm.xlu1 %1908, %v2295_v37  }
 0x431   : > { %v1147_v56 = vmul.f32 1.442695, %v1142_v41  ;;  %v2503_v41 = vld [vmem:[%s2749_s14] sm:$0xff] }
 0x433   : > { %1935 = vpow2.f32 %v1147_v56 }
 0x434   : > { %1386 = vperm.xlu1 %1908, %v2290_v34   ;;  %1937 = vpow2.f32 %v1081_v5  ;;  %v1554_v5 = vld [vmem:[%s2751_s16 + $0x18] sm:$0xff] }
 0x43d   : > { %v1181_v24 = vpop.permute.xlu1 %1180  ;;  %v1267_v50 = vpop.permute.xlu0 %1266 }
 0x43e   : > { %v1194_v26 = vmul.f32 %v1181_v24, %v2391_v19  ;;  %v1278_v62 = vmul.f32 %v1267_v50, %v2445_v55  ;;  %v1559_v24 = vld [vmem:[%s2751_s16 + $0x40] sm:$0xff]  ;;  %v1125_v50 = vmul.f32 %v2384_v16, %v2379_v15 }
 0x43f   : > { %1841 = vmatpush3.msra.mxu0 %v1559_v24 }
 0x440   : > { %v1198_v30 = vmul.f32 %v1194_v26, %v2398_v23  ;;  %v1282_v7 = vmul.f32 %v1278_v62, %v2398_v23  ;;  %v1928_v26 = vpop.eup %1927  ;;  %1842 = vmatprep.subr.mxu0 %v1991_v8  ;;  %v1129_v17 = vmul.f32 1.442695, %v1125_v50 }
 0x441   : > { %v1930_v31 = vpop.eup %1929 }
 0x442   : > { %v2417_v33 = vadd.f32 %v1398_v29, %v1198_v30  ;;  %v1211_v34 = vpop.permute.xlu1 %1210  ;;  %v1323_v25 = vpop.permute.xlu0 %1322  ;;  %v1097_v29 = vmul.f32 1.442695, %v1093_v6  ;;  %v1558_v30 = vld [vmem:[%s2751_s16 + $0x38] sm:$0xff]  ;;  %v1397_v44 = vmul.f32 0.0, %v1930_v31  ;;  %v1551_v31 = vld [vmem:[%s2751_s16] sm:$0xff] }
 0x443   : > { %v1222_v37 = vmul.f32 %v1211_v34, %v2415_v32  ;;  %v1109_v34 = vmul.f32 %v2368_v12, %v2379_v15  ;;  %1843 = vmatpush3.msra.mxu0 %v1558_v30  ;;  %v1932_v49 = vpop.eup %1931 }
 0x444   : > { %v1416_v38 = vmul.f32 %v1922_v36, %v2417_v33  ;;  %v1334_v36 = vmul.f32 %v1323_v25, %v2482_v42  ;;  %1939 = vpow2.f32 %v1097_v29  ;;  %1844 = vmatprep.subr.mxu0 %v1991_v8 }
 0x445   : > { %v1226_v45 = vmul.f32 %v1222_v37, %v2398_v23  ;;  %1845 = vmatpush3.msra.mxu0 %v1557_v39 }
 0x446   : > { %v1338_v53 = vmul.f32 %v1334_v36, %v2398_v23  ;;  %1846 = vmatprep.subr.mxu0 %v1991_v8 }
 0x447   : > { %v2440_v51 = vadd.f32 %v1416_v38, %v1226_v45  ;;  %v1239_v52 = vpop.permute.xlu1 %1238  ;;  %1847 = vmatpush3.msra.mxu0 %v1556_v48 }
 0x448   : > { %v1250_v46 = vmul.f32 %v1239_v52, %v2434_v47  ;;  %v1113_v52 = vmul.f32 1.442695, %v1109_v34  ;;  %1848 = vmatprep.subr.mxu0 %v1991_v8  ;;  %v2551_v34 = vld [vmem:[%s2748_s13 + $0x18] sm:$0xff] }
 0x449   : > { %v1434_v58 = vmul.f32 %v1924_v54, %v2440_v51  ;;  %1849 = vmatpush3.msra.mxu0 %v1555_v57  ;;  %v1048_v48 = vmul.f32 %v2333_v60, %v2551_v34 }
 0x44a   : > { %v1254_v0 = vmul.f32 %v1250_v46, %v2398_v23  ;;  %1941 = vpow2.f32 %v1113_v52  ;;  %1850 = vmatprep.subr.mxu0 %v1991_v8 }
 0x44b   : > { %1851 = vmatpush3.msra.mxu0 %v1554_v5  ;;  %1943 = vpow2.f32 %v1129_v17  ;;  %v2572_v5 = vld [vmem:[%s2748_s13 + $0x10] sm:$0xff] }
 0x44c   : > { %v2466_v11 = vadd.f32 %v1434_v58, %v1254_v0  ;;  %v1295_v14 = vpop.permute.xlu1 %1294  ;;  %v1934_v58 = vpop.eup %1933  ;;  %1852 = vmatprep.subr.mxu0 %v1991_v8 }
 0x44d   : > { %v1306_v21 = vmul.f32 %v1295_v14, %v2462_v3  ;;  %v1936_v6 = vpop.eup %1935 }
 0x44e   : > { %v1452_v22 = vmul.f32 %v1926_v20, %v2466_v11  ;;  %v1938_v24 = vpop.eup %1937 }
 0x44f   : > { %v1310_v10 = vmul.f32 %v1306_v21, %v2398_v23  ;;  %v1553_v21 = vld [vmem:[%s2751_s16 + $0x10] sm:$0xff] }
 0x450   : > { %v2484_v27 = vadd.f32 %v1452_v22, %v1282_v7  ;;  %1853 = vmatpush3.msra.mxu0 %v1553_v21 }
 0x451   : > { %v1176_v35 = vpop.permute.xlu1 %1175  ;;  %1854 = vmatprep.subr.mxu0 %v1991_v8 }
 0x452   : > { %v1470_v37 = vmul.f32 %v1928_v26, %v2484_v27  ;;  %v1193_v38 = vmul.f32 %v1176_v35, %v2391_v19  ;;  %v1552_v26 = vld [vmem:[%s2751_s16 + $0x8] sm:$0xff]  ;;  %v1291_v35 = vpop.permute.xlu0 %1290 }
 0x453   : > { %1855 = vmatpush3.msra.mxu0 %v1552_v26 }
 0x454   : > { %v2505_v43 = vadd.f32 %v1470_v37, %v1310_v10  ;;  %v1197_v45 = vmul.f32 %v1193_v38, %v2503_v41  ;;  %1856 = vmatprep.subr.mxu0 %v1991_v8  ;;  %v1940_v37 = vpop.eup %1939 }
 0x455   : > { %1857 = vmatpush3.msra.mxu0 %v1551_v31 }
 0x456   : > { %v1488_v54 = vmul.f32 %v1932_v49, %v2505_v43  ;;  %v2516_v46 = vadd.f32 %v1397_v44, %v1197_v45  ;;  %v1207_v56 = vpop.permute.xlu1 %1206  ;;  %v1305_v44 = vmul.f32 %v1291_v35, %v2462_v3  ;;  %v2587_v31 = vpop.permute.xlu0 %1302 }
 0x457   : > { %v1221_v62 = vmul.f32 %v1207_v56, %v2415_v32  ;;  %v1942_v52 = vpop.eup %1941  ;;  %v1055_v56 = vmul.f32 1.442695, %v1048_v48 }
 0x458   : > { %v1415_v0 = vmul.f32 %v1934_v58, %v2516_v46  ;;  %v1492_v1 = vadd.f32 %v1488_v54, %v1338_v53  ;;  %v1309_v53 = vmul.f32 %v1305_v44, %v2503_v41  ;;  %v1944_v58 = vpop.eup %1943 }
 0x459   : > { %v1225_v14 = vmul.f32 %v1221_v62, %v2503_v41  ;;  %1945 = vpow2.f32 %v1055_v56 }
 0x45a   : > { %v2529_v20 = vmul.f32 %v1936_v6, %v1492_v1 }
 0x45b   : > { %v2535_v7 = vadd.f32 %v1415_v0, %v1225_v14  ;;  %v1235_v22 = vpop.permute.xlu1 %1234  ;;  %v1064_v0 = vmul.f32 %v2346_v63, %v2551_v34 }
 0x45c   : > { %v1249_v25 = vmul.f32 %v1235_v22, %v2434_v47  ;;  %v1047_v22 = vmul.f32 %v2333_v60, %v2572_v5 }
 0x45d   : > { %v1433_v29 = vmul.f32 %v1938_v24, %v2535_v7 }
 0x45e   : > { %v1253_v30 = vmul.f32 %v1249_v25, %v2503_v41  ;;  %v1071_v25 = vmul.f32 1.442695, %v1064_v0 }
 0x460   : > { %v2553_v36 = vadd.f32 %v1433_v29, %v1253_v30  ;;  %v1263_v10 = vpop.permute.xlu1 %1262  ;;  %v1053_v29 = vmul.f32 1.442695, %v1047_v22  ;;  %1947 = vpow2.f32 %v1071_v25  ;;  %v1080_v30 = vmul.f32 %v2353_v2, %v2551_v34 }
 0x461   : > { %v1277_v38 = vmul.f32 %v1263_v10, %v2445_v55  ;;  %v1155_v10 = vsub.s32 7, %v2215_v40 }
 0x462   : > { %v1451_v39 = vmul.f32 %v1940_v37, %v2553_v36  ;;  %1949 = vpow2.f32 %v1053_v29  ;;  %v1087_v37 = vmul.f32 1.442695, %v1080_v30 }
 0x463   : > { %v1281_v45 = vmul.f32 %v1277_v38, %v2503_v41 }
 0x464   : > { %1951 = vpow2.f32 %v1087_v37  ;;  %v1111_v37 = vmul.f32 %v2368_v12, %v2572_v5 }
 0x465   : > { %v2562_v49 = vadd.f32 %v1451_v39, %v1281_v45  ;;  %v1319_v50 = vpop.permute.xlu1 %1318  ;;  %v2598_v39 = vld [vmem:[%s2749_s14 + $0x18] sm:$0xff] }
 0x466   : > { %v1333_v54 = vmul.f32 %v1319_v50, %v2482_v42  ;;  %v1946_v38 = vpop.eup %1945  ;;  %v1079_v50 = vmul.f32 %v2353_v2, %v2572_v5 }
 0x467   : > { %v1469_v8 = vmul.f32 %v1942_v52, %v2562_v49  ;;  %v1243_v52 = vpop.permute.xlu0 %1242 }
 0x468   : > { %v1337_v6 = vmul.f32 %v1333_v54, %v2503_v41  ;;  %v1400_v54 = vmul.f32 0.0, %v1946_v38  ;;  %v2632_v38 = vld [vmem:[%s2749_s14 + $0x10] sm:$0xff] }
 0x469   : > { %v1473_v57 = vadd.f32 %v1469_v8, %v1309_v53  ;;  %v1096_v8 = vmul.f32 %v2362_v9, %v2551_v34 }
 0x46a   : > { %v1191_v62 = vpop.permute.xlu1 %1190 }
 0x46b   : > { %v1487_v14 = vmul.f32 %v1944_v58, %v1473_v57  ;;  %v2576_v17 = vadd.f32 %v2505_v43, %v1473_v57  ;;  %v1063_v43 = vmul.f32 %v2346_v63, %v2572_v5  ;;  %v1196_v60 = vmul.f32 %v1191_v62, %v2391_v19 }
 0x46c   : > { %v2603_v63 = vrot.slane %v2327_v59, %v1155_v10  ;;  %v1085_v58 = vmul.f32 1.442695, %v1079_v50  ;;  %v1103_v0 = vmul.f32 1.442695, %v1096_v8 }
 0x46d   : > { %v2578_v21 = vadd.f32 %v1487_v14, %v1337_v6  ;;  %v1069_v44 = vmul.f32 1.442695, %v1063_v43  ;;  %v1200_v45 = vmul.f32 %v1196_v60, %v2598_v39  ;;  %v1948_v6 = vpop.eup %1947  ;;  %v1347_v14 = vpop.permute.xlu0 %1346  ;;  %v1128_v43 = vmul.f32 %v2384_v16, %v2551_v34 }
 0x46e   : > { %v1158_v56 = vmul.f32 %v2603_v63, %v2339_v61  ;;  %v1157_v62 = vmul.f32 %v2603_v63, %v2379_v15  ;;  %v1112_v61 = vmul.f32 %v2368_v12, %v2551_v34  ;;  %v1095_v60 = vmul.f32 %v2362_v9, %v2572_v5 }
 0x46f   : > { %v2583_v24 = vadd.f32 %v1492_v1, %v2578_v21  ;;  %v1219_v26 = vpop.permute.xlu1 %1218  ;;  %v1141_v1 = vmul.f32 %v2409_v28, %v2379_v15  ;;  %1953 = vpow2.f32 %v1069_v44  ;;  %v1404_v59 = vadd.f32 %v1400_v54, %v1200_v45 }
 0x470   : > { %v1224_v57 = vmul.f32 %v1219_v26, %v2415_v32  ;;  %v1163_v29 = vmul.f32 1.442695, %v1158_v56  ;;  %v1161_v30 = vmul.f32 1.442695, %v1157_v62  ;;  %v1950_v26 = vpop.eup %1949  ;;  %v2642_v12 = vmul.f32 %v2409_v28, %v2572_v5 }
 0x471   : > { %v1145_v53 = vmul.f32 1.442695, %v1141_v1  ;;  %v1418_v22 = vmul.f32 %v1948_v6, %v1404_v59  ;;  %v2635_v50 = vpop.permute.xlu0 %1358  ;;  %v1399_v8 = vmul.f32 0.0, %v1950_v26  ;;  %v2646_v54 = vmul.f32 %v2409_v28, %v2551_v34  ;;  %v1952_v56 = vpop.eup %1951 }
 0x472   : > { %v1228_v25 = vmul.f32 %v1224_v57, %v2598_v39  ;;  %v1405_v57 = vadd.f32 %v2417_v33, %v2516_v46  ;;  %v1251_v26 = vmul.f32 %v1243_v52, %v2434_v47 }
 0x473   : > { %1955 = vpow2.f32 %v1145_v53  ;;  %v1119_v53 = vmul.f32 1.442695, %v1112_v61 }
 0x474   : > { %v1247_v35 = vpop.permute.xlu1 %1246  ;;  %1957 = vpow2.f32 %v1085_v58  ;;  %v1422_v44 = vadd.f32 %v1418_v22, %v1228_v25  ;;  %v2653_v58 = vrot.slane %v2372_v13, %v1139_v18  ;;  %v2662_v18 = vrot.slane %v2372_v13, %v1155_v10 }
 0x475   : > { %1959 = vpow2.f32 %v1103_v0  ;;  %v1252_v45 = vmul.f32 %v1247_v35, %v2434_v47  ;;  %v1135_v35 = vmul.f32 1.442695, %v1128_v43  ;;  %v1101_v0 = vmul.f32 1.442695, %v1095_v60 }
 0x476   : > { %1961 = vpow2.f32 %v1163_v29  ;;  %v1436_v22 = vmul.f32 %v1952_v56, %v1422_v44  ;;  %v1117_v29 = vmul.f32 1.442695, %v1111_v37  ;;  %v1361_v61 = vmul.f32 %v1347_v14, %v2653_v58 }
 0x477   : > { %1963 = vpow2.f32 %v1161_v30  ;;  %v1256_v25 = vmul.f32 %v1252_v45, %v2598_v39 }
 0x478   : > { %1965 = vpow2.f32 %v1119_v53  ;;  %v1365_v10 = vmul.f32 %v1361_v61, %v2503_v41 }
 0x479   : > { %v2606_v48 = vpop.permute.xlu1 %1274  ;;  %1967 = vpow2.f32 %v1135_v35  ;;  %v1440_v37 = vadd.f32 %v1436_v22, %v1256_v25 }
 0x47a   : > { %1969 = vpow2.f32 %v1101_v0  ;;  %v1280_v47 = vmul.f32 %v2606_v48, %v2445_v55 }
 0x47b   : > { %1971 = vpow2.f32 %v1117_v29 }
 0x47c   : > { %v1954_v6 = vpop.eup %1953 }
 0x47e   : > { %v2617_v2 = vpop.permute.xlu1 %1330 }
 0x480   : > { %v1956_v46 = vpop.eup %1955 }
 0x481   : > { %v1958_v13 = vpop.eup %1957 }
 0x483   : > { %v1186_v15 = vpop.permute.xlu1 %1185 }
 0x484   : > { %v1195_v1 = vmul.f32 %v1186_v15, %v2391_v19  ;;  %v1127_v19 = vmul.f32 %v2384_v16, %v2572_v5  ;;  %v1379_v15 = vpop.permute.xlu0 %1378 }
 0x486   : > { %v1199_v9 = vmul.f32 %v1195_v1, %v2632_v38  ;;  %v1133_v14 = vmul.f32 1.442695, %v1127_v19  ;;  %v1423_v1 = vadd.f32 %v2440_v51, %v2535_v7  ;;  %v1960_v51 = vpop.eup %1959  ;;  %v1441_v7 = vadd.f32 %v2466_v11, %v2553_v36 }
 0x487   : > { %v1454_v56 = vmul.f32 %v1960_v51, %v1440_v37  ;;  %v1962_v0 = vpop.eup %1961 }
 0x488   : > { %v1403_v62 = vadd.f32 %v1399_v8, %v1199_v9  ;;  %v1215_v16 = vpop.permute.xlu1 %1214  ;;  %1973 = vpow2.f32 %v1133_v14  ;;  %v1964_v29 = vpop.eup %1963 }
 0x489   : > { %v1223_v28 = vmul.f32 %v1215_v16, %v2415_v32  ;;  %v1505_v32 = vmul.f32 %v1956_v46, %v2578_v21  ;;  %v1255_v21 = vmul.f32 %v1251_v26, %v2632_v38 }
 0x48a   : > { %v1406_v30 = vadd.f32 %v1405_v57, %v1403_v62  ;;  %v1417_v33 = vmul.f32 %v1954_v6, %v1403_v62  ;;  %v1284_v57 = vmul.f32 %v1280_v47, %v2598_v39  ;;  %v1159_v6 = vmul.f32 %v2603_v63, %v2572_v5 }
 0x48b   : > { %v1227_v43 = vmul.f32 %v1223_v28, %v2632_v38  ;;  %v1509_v35 = vadd.f32 %v1505_v32, %v1365_v10  ;;  %v1308_v47 = vmul.f32 %v2587_v31, %v2462_v3 }
 0x48c   : > { %v1407_v60 = vadd.f32 %v1406_v30, %v1404_v59  ;;  %v1390_v59 = vmul.f32 %v1379_v15, %v2662_v18  ;;  %v1165_v31 = vmul.f32 1.442695, %v1159_v6 }
 0x48d   : > { %v1421_v40 = vadd.f32 %v1417_v33, %v1227_v43  ;;  %v1351_v52 = vpop.permute.xlu1 %1350  ;;  %v1523_v26 = vmul.f32 %v1964_v29, %v1509_v35  ;;  %v1458_v43 = vadd.f32 %v1454_v56, %v1284_v57  ;;  %v1336_v29 = vmul.f32 %v2617_v2, %v2482_v42 }
 0x48e   : > { %v1408_v45 = vrot.slane %v1407_v60, 4  ;;  %v1362_v53 = vmul.f32 %v1351_v52, %v2653_v58  ;;  %v1394_v11 = vmul.f32 %v1390_v59, %v2398_v23 }
 0x48f   : > { %v1424_v8 = vadd.f32 %v1423_v1, %v1421_v40  ;;  %v1435_v9 = vmul.f32 %v1958_v13, %v1421_v40  ;;  %v1966_v1 = vpop.eup %1965 }
 0x490   : > { %v1409_v48 = vadd.f32 %v1408_v45, %v1407_v60  ;;  %v1366_v19 = vmul.f32 %v1362_v53, %v2398_v23  ;;  %v1149_v23 = vmul.f32 1.442695, %v2642_v12  ;;  %v1968_v45 = vpop.eup %1967 }
 0x491   : > { %v1425_v62 = vadd.f32 %v1424_v8, %v1422_v44  ;;  %v1439_v16 = vadd.f32 %v1435_v9, %v1255_v21 }
 0x492   : > { %v1410_v22 = vrot.slane %v1409_v48, 2  ;;  %v1510_v25 = vadd.f32 %v2529_v20, %v1366_v19  ;;  %v1375_v28 = vpop.permute.xlu1 %1374  ;;  %v1151_v20 = vmul.f32 1.442695, %v2646_v54  ;;  %1975 = vpow2.f32 %v1149_v23 }
 0x493   : > { %v1426_v36 = vrot.slane %v1425_v62, 4  ;;  %v1389_v61 = vmul.f32 %v1375_v28, %v2662_v18  ;;  %v1442_v30 = vadd.f32 %v1441_v7, %v1439_v16  ;;  %v1312_v7 = vmul.f32 %v1308_v47, %v2598_v39 }
 0x494   : > { %v1411_v33 = vadd.f32 %v1410_v22, %v1409_v48  ;;  %v2683_v46 = vadd.f32 %v1510_v25, %v1509_v35  ;;  %v1524_v44 = vmul.f32 %v1962_v0, %v1510_v25  ;;  %1977 = vpow2.f32 %v1151_v20 }
 0x495   : > { %v1427_v15 = vadd.f32 %v1426_v36, %v1425_v62  ;;  %v1393_v5 = vmul.f32 %v1389_v61, %v2503_v41  ;;  %v1443_v32 = vadd.f32 %v1442_v30, %v1440_v37  ;;  %v1970_v41 = vpop.eup %1969  ;;  %v1472_v37 = vmul.f32 %v1966_v1, %v1458_v43 }
 0x496   : > { %v1412_v60 = vrot.slane %v1411_v33, 1  ;;  %v1528_v14 = vadd.f32 %v1524_v44, %v1394_v11  ;;  %v1453_v9 = vmul.f32 %v1970_v41, %v1439_v16  ;;  %v1972_v51 = vpop.eup %1971  ;;  %v1459_v35 = vadd.f32 %v2484_v27, %v2562_v49 }
 0x497   : > { %v1428_v40 = vrot.slane %v1427_v15, 2  ;;  %v1527_v52 = vadd.f32 %v1523_v26, %v1393_v5  ;;  %v1271_v13 = vpop.permute.xlu1 %1270  ;;  %v1444_v10 = vrot.slane %v1443_v32, 4  ;;  %v1476_v62 = vadd.f32 %v1472_v37, %v1312_v7  ;;  %v1974_v28 = vpop.eup %1973 }
 0x498   : > { %v1413_v53 = vadd.f32 %v1412_v60, %v1411_v33  ;;  %v1279_v21 = vmul.f32 %v1271_v13, %v2445_v55  ;;  %v1160_v55 = vmul.f32 %v2603_v63, %v2551_v34  ;;  %1979 = vpow2.f32 %v1165_v31 }
 0x499   : > { %v1429_v59 = vadd.f32 %v1428_v40, %v1427_v15  ;;  %v2691_v54 = vadd.f32 %v1528_v14, %v1527_v52  ;;  %v1445_v8 = vadd.f32 %v1444_v10, %v1443_v32  ;;  %v1490_v49 = vmul.f32 %v1968_v45, %v1476_v62 }
 0x49a   : > { %1414 = vst [vmem:[#allocation2] sm:$0x1] %v1413_v53  ;;  %v1283_v12 = vmul.f32 %v1279_v21, %v2632_v38  ;;  %v1167_v27 = vmul.f32 1.442695, %v1160_v55  ;;  %v1340_v44 = vmul.f32 %v1336_v29, %v2598_v39  ;;  %v1364_v1 = vmul.f32 %v2635_v50, %v2653_v58 }
 0x49b   : > { %v1430_v48 = vrot.slane %v1429_v59, 1  ;;  %v1446_v19 = vrot.slane %v1445_v8, 2 }
 0x49c   : > { %v1457_v56 = vadd.f32 %v1453_v9, %v1283_v12  ;;  %v1299_v57 = vpop.permute.xlu1 %1298  ;;  %1981 = vpow2.f32 %v1167_v27  ;;  %v1494_v32 = vadd.f32 %v1490_v49, %v1340_v44  ;;  %v1368_v37 = vmul.f32 %v1364_v1, %v2598_v39 }
 0x49d   : > { %v1431_v0 = vadd.f32 %v1430_v48, %v1429_v59  ;;  %v1447_v22 = vadd.f32 %v1446_v19, %v1445_v8  ;;  %v1307_v16 = vmul.f32 %v1299_v57, %v2462_v3 }
 0x49e   : > { %v1460_v6 = vadd.f32 %v1459_v35, %v1457_v56  ;;  %v1471_v25 = vmul.f32 %v1972_v51, %v1457_v56 }
 0x49f   : > { %1432 = vst [vmem:[#allocation2 + $0x1] sm:$0x1] %v1431_v0  ;;  %v1448_v11 = vrot.slane %v1447_v22, 1  ;;  %v1311_v34 = vmul.f32 %v1307_v16, %v2632_v38  ;;  %v1976_v23 = vpop.eup %1975 }
 0x4a0   : > { %v1461_v63 = vadd.f32 %v1460_v6, %v1458_v43 }
 0x4a1   : > { %v1449_v36 = vadd.f32 %v1448_v11, %v1447_v22  ;;  %v1475_v61 = vadd.f32 %v1471_v25, %v1311_v34  ;;  %v1327_v30 = vpop.permute.xlu1 %1326  ;;  %v1978_v40 = vpop.eup %1977 }
 0x4a2   : > { %v1462_v33 = vrot.slane %v1461_v63, 4  ;;  %v1335_v3 = vmul.f32 %v1327_v30, %v2482_v42  ;;  %v1508_v10 = vmul.f32 %v1978_v40, %v1494_v32 }
 0x4a3   : > { %1450 = vst [vmem:[#allocation2 + $0x2] sm:$0x1] %v1449_v36  ;;  %v1478_v26 = vadd.f32 %v2576_v17, %v1475_v61  ;;  %v1489_v2 = vmul.f32 %v1974_v28, %v1475_v61 }
 0x4a4   : > { %v1463_v15 = vadd.f32 %v1462_v33, %v1461_v63  ;;  %v1339_v5 = vmul.f32 %v1335_v3, %v2632_v38  ;;  %v1512_v51 = vadd.f32 %v1508_v10, %v1368_v37 }
 0x4a5   : > { %v1479_v43 = vadd.f32 %v1478_v26, %v1476_v62  ;;  %v1980_v50 = vpop.eup %1979 }
 0x4a6   : > { %v1464_v20 = vrot.slane %v1463_v15, 2  ;;  %v1493_v60 = vadd.f32 %v1489_v2, %v1339_v5  ;;  %v1355_v14 = vpop.permute.xlu1 %1354  ;;  %v1714_v2 = vld [vmem:[%s2750_s15] ss:$0 sm:$0xff] }
 0x4a7   : > { %v1480_v42 = vrot.slane %v1479_v43, 4  ;;  %v1363_v47 = vmul.f32 %v1355_v14, %v2653_v58 }
 0x4a8   : > { %v1465_v52 = vadd.f32 %v1464_v20, %v1463_v15  ;;  %v1496_v17 = vadd.f32 %v2583_v24, %v1493_v60  ;;  %v1507_v13 = vmul.f32 %v1976_v23, %v1493_v60  ;;  %v1549_v15 = vmul.f32 %v1714_v2, %v2240_v4 }
 0x4a9   : > { %v1481_v45 = vadd.f32 %v1480_v42, %v1479_v43  ;;  %v1367_v53 = vmul.f32 %v1363_v47, %v2632_v38  ;;  %v1982_v16 = vpop.eup %1981  ;;  %v1715_v43 = vld [vmem:[%s2752_s17] ss:$0 sm:$0xff] }
 0x4aa   : > { %v1466_v21 = vrot.slane %v1465_v52, 1  ;;  %v1497_v41 = vadd.f32 %v1496_v17, %v1494_v32  ;;  %v1526_v11 = vmul.f32 %v1982_v16, %v1512_v51 }
 0x4ab   : > { %v1482_v59 = vrot.slane %v1481_v45, 2  ;;  %v1511_v8 = vadd.f32 %v1507_v13, %v1367_v53  ;;  %v1383_v12 = vpop.permute.xlu1 %1382 }
 0x4ac   : > { %v1467_v9 = vadd.f32 %v1466_v21, %v1465_v52  ;;  %v1498_v31 = vrot.slane %v1497_v41, 4  ;;  %v1391_v58 = vmul.f32 %v1383_v12, %v2662_v18 }
 0x4ad   : > { %v1483_v7 = vadd.f32 %v1482_v59, %v1481_v45  ;;  %v1514_v24 = vadd.f32 %v2683_v46, %v1511_v8  ;;  %v1525_v48 = vmul.f32 %v1980_v50, %v1511_v8 }
 0x4ae   : > { %1468 = vst [vmem:[#allocation2 + $0x3] sm:$0x1] %v1467_v9  ;;  %v1499_v19 = vadd.f32 %v1498_v31, %v1497_v41  ;;  %v1395_v55 = vmul.f32 %v1391_v58, %v2632_v38 }
 0x4af   : > { %v1484_v35 = vrot.slane %v1483_v7, 1  ;;  %v1515_v56 = vadd.f32 %v1514_v24, %v1512_v51  ;;  %v1387_v57 = vpop.permute.xlu1 %1386 }
 0x4b0   : > { %v1500_v62 = vrot.slane %v1499_v19, 2  ;;  %v1529_v0 = vadd.f32 %v1525_v48, %v1395_v55  ;;  %v1392_v22 = vmul.f32 %v1387_v57, %v2662_v18 }
 0x4b1   : > { %v1485_v6 = vadd.f32 %v1484_v35, %v1483_v7  ;;  %v1516_v25 = vrot.slane %v1515_v56, 4 }
 0x4b2   : > { %v1501_v28 = vadd.f32 %v1500_v62, %v1499_v19  ;;  %v1532_v29 = vadd.f32 %v2691_v54, %v1529_v0  ;;  %v1396_v46 = vmul.f32 %v1392_v22, %v2598_v39 }
 0x4b3   : > { %1486 = vst [vmem:[#allocation2 + $0x4] sm:$0x1] %v1485_v6  ;;  %v1517_v34 = vadd.f32 %v1516_v25, %v1515_v56 }
 0x4b4   : > { %v1502_v63 = vrot.slane %v1501_v28, 1  ;;  %v1530_v38 = vadd.f32 %v1526_v11, %v1396_v46 }
 0x4b5   : > { %v1518_v27 = vrot.slane %v1517_v34, 2 }
 0x4b6   : > { %v1503_v49 = vadd.f32 %v1502_v63, %v1501_v28  ;;  %v1533_v36 = vadd.f32 %v1532_v29, %v1530_v38 }
 0x4b7   : > { %v1519_v61 = vadd.f32 %v1518_v27, %v1517_v34 }
 0x4b8   : > { %1504 = vst [vmem:[#allocation2 + $0x5] sm:$0x1] %v1503_v49  ;;  %v1534_v30 = vrot.slane %v1533_v36, 4 }
 0x4b9   : > { %v1520_v18 = vrot.slane %v1519_v61, 1 }
 0x4ba   : > { %v1535_v33 = vadd.f32 %v1534_v30, %v1533_v36 }
 0x4bb   : > { %v1521_v3 = vadd.f32 %v1520_v18, %v1519_v61 }
 0x4bc   : > { %v1536_v44 = vrot.slane %v1535_v33, 2 }
 0x4bd   : > { %1522 = vst [vmem:[#allocation2 + $0x6] sm:$0x1] %v1521_v3 }
 0x4be   : > { %v1537_v54 = vadd.f32 %v1536_v44, %v1535_v33 }
 0x4c0   : > { %v1538_v26 = vrot.slane %v1537_v54, 1 }
 0x4c2   : > { %v1539_v39 = vadd.f32 %v1538_v26, %v1537_v54 }
 0x4c4   : > { %1540 = vst [vmem:[#allocation2 + $0x7] sm:$0x1] %v1539_v39 }
 0x4cb   : > { %v1541_v5 = vld [vmem:[#allocation2] sm:$0xff] }
 0x4cc   : > { %v1550_v32 = vadd.f32 %v1549_v15, %v1541_v5 }
 0x4ce   : > { %1859 = vmatmul.mubr.f32.vlgmr.msra.gmra.mxu0 %v1550_v32 }
 0x58e   : > { %v1640_v20 = vpop.f32.mrf.mxu0 }
 0x58f   : > { %v1641_v60 = vadd.f32 %v1715_v43, %v1640_v20 }
 0x590   : > { %v1860_v14 = vpop.f32.mrf.mxu0 }
 0x591   : > { %v1644_v23 = vmul.f32 0.5, %v1641_v60 }
 0x593   : > { %1645 = vst.msk [vmem:[%s570_s19] sm:$0xff] %vm574_vm0, %v1644_v23 }
 0x594 PF: > { %s28_s27 = sadd.s32 1, %s1989_s27  }
 0x595   : > { %p25_p4 = scmp.ge.s32.totalorder %s28_s27, 4  }
 0x597   :  { %27 = sbr.rel (!%p25_p4) target bundleno = 4 (0x4), region = 122 }

</bundles_post_ra>
